<compile_context>
chip_gen: v6e
topology: v6e:2x2x1
jax: 0.10.0
libtpu: 0.0.40
codegen_flags: <defaults>
</compile_context>

<pallas_src>
import functools

import jax
import jax.numpy as jnp
import numpy as np
from jax import lax
from jax.experimental import pallas as pl
from jax.experimental.pallas import tpu as pltpu


def _round_up(x, m):
    return ((x + m - 1) // m) * m


def _reorder_gates(w, H):
    """Reorder gate blocks (i, f, g, o) -> (i, f, o, g) along the last axis."""
    i = w[..., 0 * H:1 * H]
    f = w[..., 1 * H:2 * H]
    g = w[..., 2 * H:3 * H]
    o = w[..., 3 * H:4 * H]
    return jnp.concatenate([i, f, o, g], axis=-1)


# ----------------------------------------------------------------------------
# In-kernel LSTM cell.  `gin` is the precomputed x @ Wx + b for this step
# (gate order i, f, o, g), so only h @ Wh sits on the serial chain.
# ----------------------------------------------------------------------------
def _lstm_cell(gin, h, c, wh, H):
    gates = gin + jnp.dot(h, wh, preferred_element_type=jnp.float32)
    sig = jax.nn.sigmoid(gates[:, :3 * H])      # i, f, o in one EUP pass
    g = jnp.tanh(gates[:, 3 * H:])
    i = sig[:, 0 * H:1 * H]
    f = sig[:, 1 * H:2 * H]
    o = sig[:, 2 * H:3 * H]
    c_new = f * c + i * g
    h_new = o * jnp.tanh(c_new)
    return h_new, c_new


# ----------------------------------------------------------------------------
# Fused seq2seq kernel for one batch tile: encoder LSTM over xg, decoder LSTM
# over yg (teacher forced), emitting every decoder hidden state.  h/c live as
# loop carries in vregs; weights are loaded once.
# ----------------------------------------------------------------------------
def seq2seq_kernel(xg_ref, yg_ref, ewh_ref, dwh_ref, hs_ref,
                   *, H, T_in, T_out):
    TB = xg_ref.shape[1]

    ewh = ewh_ref[...]
    dwh = dwh_ref[...]

    h0 = jnp.zeros((TB, H), jnp.float32)
    c0 = jnp.zeros((TB, H), jnp.float32)

    def enc_step(t, carry):
        h, c = carry
        return _lstm_cell(xg_ref[t], h, c, ewh, H)

    h, c = lax.fori_loop(0, T_in, enc_step, (h0, c0),
                         unroll=min(8, T_in))

    def dec_step(t, carry):
        h, c = carry
        h, c = _lstm_cell(yg_ref[t], h, c, dwh, H)
        hs_ref[t] = h
        return (h, c)

    lax.fori_loop(0, T_out, dec_step, (h, c), unroll=min(8, T_out))


def seq2seq_hidden_states(xg, yg, ewh, dwh, hid_dim, batch_tile):
    """xg: (T_in, Bp, 4H) ; yg: (T_out, Bp, 4H) ; returns hs (T_out, Bp, H)."""
    T_in, B_pad, G = xg.shape
    T_out = yg.shape[0]
    H = hid_dim
    TB = batch_tile
    assert B_pad % TB == 0 and TB % 8 == 0

    kern = functools.partial(seq2seq_kernel, H=H, T_in=T_in, T_out=T_out)
    return pl.pallas_call(
        kern,
        out_shape=jax.ShapeDtypeStruct((T_out, B_pad, H), jnp.float32),
        grid=(B_pad // TB,),
        in_specs=[
            pl.BlockSpec((T_in, TB, G), lambda b: (0, b, 0)),
            pl.BlockSpec((T_out, TB, G), lambda b: (0, b, 0)),
            pl.BlockSpec((H, G), lambda b: (0, 0)),
            pl.BlockSpec((H, G), lambda b: (0, 0)),
        ],
        out_specs=pl.BlockSpec((T_out, TB, H), lambda b: (0, b, 0)),
        compiler_params=pltpu.CompilerParams(
            dimension_semantics=("parallel",)),
    )(xg, yg, ewh, dwh)


# ----------------------------------------------------------------------------
# Generator: parameters + forward
# ----------------------------------------------------------------------------
def init_generator_params(key, inp_voc, tgt_voc, emb_size, hid_dim):
    ks = jax.random.split(key, 10)
    s = 0.1
    params = {
        # nn.Embedding(inp_voc + 1, emb_size, padding_idx=inp_voc)
        "inp_emb": jax.random.normal(ks[0], (inp_voc + 1, emb_size), jnp.float32) * s,
        # encoder LSTM (gate order i, f, g, o — PyTorch convention)
        "enc_wx": jax.random.normal(ks[1], (emb_size, 4 * hid_dim), jnp.float32) * s,
        "enc_wh": jax.random.normal(ks[2], (hid_dim, 4 * hid_dim), jnp.float32) * s,
        "enc_b": jax.random.normal(ks[3], (1, 4 * hid_dim), jnp.float32) * s,
        # decoder embedding (target vocab -> emb_size)
        "dec_emb": jax.random.normal(ks[4], (tgt_voc, emb_size), jnp.float32) * s,
        # decoder LSTM
        "dec_wx": jax.random.normal(ks[5], (emb_size, 4 * hid_dim), jnp.float32) * s,
        "dec_wh": jax.random.normal(ks[6], (hid_dim, 4 * hid_dim), jnp.float32) * s,
        "dec_b": jax.random.normal(ks[7], (1, 4 * hid_dim), jnp.float32) * s,
        # output projection hid_dim -> target vocab
        "dec_wout": jax.random.normal(ks[8], (hid_dim, tgt_voc), jnp.float32) * s,
        "dec_bout": jax.random.normal(ks[9], (1, tgt_voc), jnp.float32) * s,
    }
    # padding_idx row is zeros (PyTorch semantics)
    params["inp_emb"] = params["inp_emb"].at[inp_voc].set(0.0)
    return params


@functools.partial(jax.jit, static_argnums=(3, 4))
def generator_forward(params, inp_ten, out_ten, hid_dim, tgt_voc):
    """inp_ten: (B, T_in) int32 ; out_ten: (B, T_out) int32 -> (B, T_out, V)."""
    del tgt_voc  # vocab size comes from the projection weight shape
    H = hid_dim
    B = inp_ten.shape[0]
    prec = lax.Precision.HIGHEST

    # Pad batch to the f32 sublane (>=8) and pick a batch tile for the grid.
    TB = min(_round_up(B, 8), 128)
    B_pad = _round_up(B, TB)
    if B_pad != B:
        inp_ten = jnp.pad(inp_ten, ((0, B_pad - B), (0, 0)))
        out_ten = jnp.pad(out_ten, ((0, B_pad - B), (0, 0)))

    # Embedding gathers emit time-major (T, Bp, E) directly (indices are
    # transposed, not the embedded activations).
    x_tbe = jnp.take(params["inp_emb"], inp_ten.T, axis=0)   # (T_in,  Bp, E)
    y_tbe = jnp.take(params["dec_emb"], out_ten.T, axis=0)   # (T_out, Bp, E)

    # Gate reorder (i,f,g,o) -> (i,f,o,g): one sigmoid over 3H lanes + one
    # tanh over H lanes per step inside the kernel.
    ewx = _reorder_gates(params["enc_wx"], H)
    ewh = _reorder_gates(params["enc_wh"], H)
    eb = _reorder_gates(params["enc_b"], H)
    dwx = _reorder_gates(params["dec_wx"], H)
    dwh = _reorder_gates(params["dec_wh"], H)
    db = _reorder_gates(params["dec_b"], H)

    # Input projections hoisted out of the serial recurrence: one batched
    # (T*Bp, E) @ (E, 4H) matmul each, bias folded in.
    xg = jnp.einsum("tbe,eg->tbg", x_tbe, ewx, precision=prec) + eb
    yg = jnp.einsum("tbe,eg->tbg", y_tbe, dwx, precision=prec) + db

    hs = seq2seq_hidden_states(xg, yg, ewh, dwh, H, TB)      # (T_out, Bp, H)

    # Vocab projection on the true H (no zero K rows); the batch-major
    # transpose is absorbed into the einsum.
    logits = jnp.einsum("tbh,hv->btv", hs[:, :B, :], params["dec_wout"],
                        precision=prec)
    return logits + params["dec_bout"]                        # (B, T_out, V)


# ----------------------------------------------------------------------------
# Pure-JAX reference (lax.scan LSTM, PyTorch gate order) for validation
# ----------------------------------------------------------------------------
def _ref_lstm(x_tbe, wx, wh, b, h0, c0, H):
    prec = lax.Precision.HIGHEST

    def step(carry, x_t):
        h, c = carry
        gates = (jnp.dot(x_t, wx, precision=prec)
                 + jnp.dot(h, wh, precision=prec) + b)
        i = jax.nn.sigmoid(gates[:, 0 * H:1 * H])
        f = jax.nn.sigmoid(gates[:, 1 * H:2 * H])
        g = jnp.tanh(gates[:, 2 * H:3 * H])
        o = jax.nn.sigmoid(gates[:, 3 * H:4 * H])
        c_new = f * c + i * g
        h_new = o * jnp.tanh(c_new)
        return (h_new, c_new), h_new

    (h, c), hs = jax.lax.scan(step, (h0, c0), x_tbe)
    return h, c, hs


def generator_forward_ref(params, inp_ten, out_ten, hid_dim):
    x = jnp.take(params["inp_emb"], inp_ten, axis=0)
    y = jnp.take(params["dec_emb"], out_ten, axis=0)
    x_tbe = jnp.transpose(x, (1, 0, 2))
    y_tbe = jnp.transpose(y, (1, 0, 2))
    B = inp_ten.shape[0]
    z = jnp.zeros((B, hid_dim), jnp.float32)
    h, c, _ = _ref_lstm(x_tbe, params["enc_wx"], params["enc_wh"],
                        params["enc_b"], z, z, hid_dim)
    _, _, hs = _ref_lstm(y_tbe, params["dec_wx"], params["dec_wh"],
                         params["dec_b"], h, c, hid_dim)
    logits = jnp.einsum("tbh,hv->tbv", hs, params["dec_wout"],
                        precision=lax.Precision.HIGHEST) + params["dec_bout"]
    return jnp.transpose(logits, (1, 0, 2))                   # (B, T_out, V)


if __name__ == "__main__":
    B = 2            # batch (padded to 8 internally; real workloads: B >= 8)
    T_IN = 8         # source sequence length
    T_OUT = 8        # target sequence length
    EMB = 32         # emb_size
    HID = 32         # hid_dim
    INP_VOC = 10     # inp_enc.sym_amount
    TGT_VOC = 16     # target_enc.sym_amount

    key = jax.random.PRNGKey(0)
    kp, ki, ko = jax.random.split(key, 3)
    params = init_generator_params(kp, INP_VOC, TGT_VOC, EMB, HID)
    inp_ten = jax.random.randint(ki, (B, T_IN), 0, INP_VOC, dtype=jnp.int32)
    out_ten = jax.random.randint(ko, (B, T_OUT), 0, TGT_VOC, dtype=jnp.int32)

    logits = generator_forward(params, inp_ten, out_ten, HID, TGT_VOC)
    logits = jax.block_until_ready(logits)

    ref = jax.block_until_ready(
        generator_forward_ref(params, inp_ten, out_ten, HID))
    np.testing.assert_allclose(np.asarray(logits), np.asarray(ref),
                               rtol=1e-5, atol=1e-5)

    assert logits.shape == (B, T_OUT, TGT_VOC)
    print("KERNEL_OK")
</pallas_src>

<mosaic_0001>
module attributes {stable_mosaic.version = 11 : i64} {
  func.func @seq2seq_kernel(%arg0: i32, %arg1: memref<8x8x128xf32, #tpu.memory_space<vmem>>, %arg2: memref<8x8x128xf32, #tpu.memory_space<vmem>>, %arg3: memref<32x128xf32, #tpu.memory_space<vmem>>, %arg4: memref<32x128xf32, #tpu.memory_space<vmem>>, %arg5: memref<8x8x32xf32, #tpu.memory_space<vmem>>) attributes {dimension_semantics = [#tpu.dimension_semantics<parallel>], iteration_bounds = array<i64: 1>, scalar_prefetch = 0 : i64, scratch_operands = 0 : i64, tpu.core_type = #tpu.core_type<tc>, window_params = [{transform_indices = @transform_0, window_bounds = array<i64: 8, 8, 128>}, {transform_indices = @transform_1, window_bounds = array<i64: 8, 8, 128>}, {pipeline_mode = #tpu.pipeline_mode<synchronous>, transform_indices = @transform_2, window_bounds = array<i64: 32, 128>}, {pipeline_mode = #tpu.pipeline_mode<synchronous>, transform_indices = @transform_3, window_bounds = array<i64: 32, 128>}, {transform_indices = @transform_4, window_bounds = array<i64: 8, 8, 32>}]} {
    %c0 = arith.constant 0 : index
    %c0_0 = arith.constant 0 : index
    %0 = vector.load %arg3[%c0, %c0_0] : memref<32x128xf32, #tpu.memory_space<vmem>>, vector<32x128xf32>
    %c0_1 = arith.constant 0 : index
    %c0_2 = arith.constant 0 : index
    %1 = vector.load %arg4[%c0_1, %c0_2] : memref<32x128xf32, #tpu.memory_space<vmem>>, vector<32x128xf32>
    %cst = arith.constant 0.000000e+00 : f32
    %2 = vector.broadcast %cst : f32 to vector<8x32xf32>
    %cst_3 = arith.constant 0.000000e+00 : f32
    %3 = vector.broadcast %cst_3 : f32 to vector<8x32xf32>
    %c0_i32 = arith.constant 0 : i32
    %4 = arith.index_cast %c0_i32 : i32 to index
    %c0_4 = arith.constant 0 : index
    %c0_5 = arith.constant 0 : index
    %5 = vector.load %arg1[%4, %c0_4, %c0_5] : memref<8x8x128xf32, #tpu.memory_space<vmem>>, vector<1x8x128xf32>
    %6 = vector.shape_cast %5 : vector<1x8x128xf32> to vector<8x128xf32>
    %cst_6 = arith.constant dense<0.000000e+00> : vector<8x128xf32>
    %7 = tpu.matmul %2, %0, %cst_6 {dimension_numbers = #tpu.dot_dimension_numbers<[1], [0], [0], [1], [0, 0, 1, 1], [], []>} : vector<8x32xf32>, vector<32x128xf32>, vector<8x128xf32> -> vector<8x128xf32>
    %8 = arith.addf %6, %7 : vector<8x128xf32>
    %9 = vector.extract_strided_slice %8 {offsets = [0, 0], sizes = [8, 96], strides = [1, 1]} : vector<8x128xf32> to vector<8x96xf32>
    %10 = arith.negf %9 : vector<8x96xf32>
    %11 = math.exp %10 : vector<8x96xf32>
    %cst_7 = arith.constant 1.000000e+00 : f32
    %12 = vector.broadcast %cst_7 : f32 to vector<8x96xf32>
    %13 = arith.addf %12, %11 : vector<8x96xf32>
    %14 = arith.divf %12, %13 : vector<8x96xf32>
    %15 = vector.extract_strided_slice %8 {offsets = [0, 96], sizes = [8, 32], strides = [1, 1]} : vector<8x128xf32> to vector<8x32xf32>
    %16 = math.tanh %15 : vector<8x32xf32>
    %17 = vector.extract_strided_slice %14 {offsets = [0, 0], sizes = [8, 32], strides = [1, 1]} : vector<8x96xf32> to vector<8x32xf32>
    %18 = vector.extract_strided_slice %14 {offsets = [0, 32], sizes = [8, 32], strides = [1, 1]} : vector<8x96xf32> to vector<8x32xf32>
    %19 = vector.extract_strided_slice %14 {offsets = [0, 64], sizes = [8, 32], strides = [1, 1]} : vector<8x96xf32> to vector<8x32xf32>
    %20 = arith.mulf %18, %3 : vector<8x32xf32>
    %21 = arith.mulf %17, %16 : vector<8x32xf32>
    %22 = arith.addf %20, %21 : vector<8x32xf32>
    %23 = math.tanh %22 : vector<8x32xf32>
    %24 = arith.mulf %19, %23 : vector<8x32xf32>
    %c1_i32 = arith.constant 1 : i32
    %25 = arith.index_cast %c1_i32 : i32 to index
    %c0_8 = arith.constant 0 : index
    %c0_9 = arith.constant 0 : index
    %26 = vector.load %arg1[%25, %c0_8, %c0_9] : memref<8x8x128xf32, #tpu.memory_space<vmem>>, vector<1x8x128xf32>
    %27 = vector.shape_cast %26 : vector<1x8x128xf32> to vector<8x128xf32>
    %cst_10 = arith.constant dense<0.000000e+00> : vector<8x128xf32>
    %28 = tpu.matmul %24, %0, %cst_10 {dimension_numbers = #tpu.dot_dimension_numbers<[1], [0], [0], [1], [0, 0, 1, 1], [], []>} : vector<8x32xf32>, vector<32x128xf32>, vector<8x128xf32> -> vector<8x128xf32>
    %29 = arith.addf %27, %28 : vector<8x128xf32>
    %30 = vector.extract_strided_slice %29 {offsets = [0, 0], sizes = [8, 96], strides = [1, 1]} : vector<8x128xf32> to vector<8x96xf32>
    %31 = arith.negf %30 : vector<8x96xf32>
    %32 = math.exp %31 : vector<8x96xf32>
    %cst_11 = arith.constant 1.000000e+00 : f32
    %33 = vector.broadcast %cst_11 : f32 to vector<8x96xf32>
    %34 = arith.addf %33, %32 : vector<8x96xf32>
    %35 = arith.divf %33, %34 : vector<8x96xf32>
    %36 = vector.extract_strided_slice %29 {offsets = [0, 96], sizes = [8, 32], strides = [1, 1]} : vector<8x128xf32> to vector<8x32xf32>
    %37 = math.tanh %36 : vector<8x32xf32>
    %38 = vector.extract_strided_slice %35 {offsets = [0, 0], sizes = [8, 32], strides = [1, 1]} : vector<8x96xf32> to vector<8x32xf32>
    %39 = vector.extract_strided_slice %35 {offsets = [0, 32], sizes = [8, 32], strides = [1, 1]} : vector<8x96xf32> to vector<8x32xf32>
    %40 = vector.extract_strided_slice %35 {offsets = [0, 64], sizes = [8, 32], strides = [1, 1]} : vector<8x96xf32> to vector<8x32xf32>
    %41 = arith.mulf %39, %22 : vector<8x32xf32>
    %42 = arith.mulf %38, %37 : vector<8x32xf32>
    %43 = arith.addf %41, %42 : vector<8x32xf32>
    %44 = math.tanh %43 : vector<8x32xf32>
    %45 = arith.mulf %40, %44 : vector<8x32xf32>
    %c2_i32 = arith.constant 2 : i32
    %46 = arith.index_cast %c2_i32 : i32 to index
    %c0_12 = arith.constant 0 : index
    %c0_13 = arith.constant 0 : index
    %47 = vector.load %arg1[%46, %c0_12, %c0_13] : memref<8x8x128xf32, #tpu.memory_space<vmem>>, vector<1x8x128xf32>
    %48 = vector.shape_cast %47 : vector<1x8x128xf32> to vector<8x128xf32>
    %cst_14 = arith.constant dense<0.000000e+00> : vector<8x128xf32>
    %49 = tpu.matmul %45, %0, %cst_14 {dimension_numbers = #tpu.dot_dimension_numbers<[1], [0], [0], [1], [0, 0, 1, 1], [], []>} : vector<8x32xf32>, vector<32x128xf32>, vector<8x128xf32> -> vector<8x128xf32>
    %50 = arith.addf %48, %49 : vector<8x128xf32>
    %51 = vector.extract_strided_slice %50 {offsets = [0, 0], sizes = [8, 96], strides = [1, 1]} : vector<8x128xf32> to vector<8x96xf32>
    %52 = arith.negf %51 : vector<8x96xf32>
    %53 = math.exp %52 : vector<8x96xf32>
    %cst_15 = arith.constant 1.000000e+00 : f32
    %54 = vector.broadcast %cst_15 : f32 to vector<8x96xf32>
    %55 = arith.addf %54, %53 : vector<8x96xf32>
    %56 = arith.divf %54, %55 : vector<8x96xf32>
    %57 = vector.extract_strided_slice %50 {offsets = [0, 96], sizes = [8, 32], strides = [1, 1]} : vector<8x128xf32> to vector<8x32xf32>
    %58 = math.tanh %57 : vector<8x32xf32>
    %59 = vector.extract_strided_slice %56 {offsets = [0, 0], sizes = [8, 32], strides = [1, 1]} : vector<8x96xf32> to vector<8x32xf32>
    %60 = vector.extract_strided_slice %56 {offsets = [0, 32], sizes = [8, 32], strides = [1, 1]} : vector<8x96xf32> to vector<8x32xf32>
    %61 = vector.extract_strided_slice %56 {offsets = [0, 64], sizes = [8, 32], strides = [1, 1]} : vector<8x96xf32> to vector<8x32xf32>
    %62 = arith.mulf %60, %43 : vector<8x32xf32>
    %63 = arith.mulf %59, %58 : vector<8x32xf32>
    %64 = arith.addf %62, %63 : vector<8x32xf32>
    %65 = math.tanh %64 : vector<8x32xf32>
    %66 = arith.mulf %61, %65 : vector<8x32xf32>
    %c3_i32 = arith.constant 3 : i32
    %67 = arith.index_cast %c3_i32 : i32 to index
    %c0_16 = arith.constant 0 : index
    %c0_17 = arith.constant 0 : index
    %68 = vector.load %arg1[%67, %c0_16, %c0_17] : memref<8x8x128xf32, #tpu.memory_space<vmem>>, vector<1x8x128xf32>
    %69 = vector.shape_cast %68 : vector<1x8x128xf32> to vector<8x128xf32>
    %cst_18 = arith.constant dense<0.000000e+00> : vector<8x128xf32>
    %70 = tpu.matmul %66, %0, %cst_18 {dimension_numbers = #tpu.dot_dimension_numbers<[1], [0], [0], [1], [0, 0, 1, 1], [], []>} : vector<8x32xf32>, vector<32x128xf32>, vector<8x128xf32> -> vector<8x128xf32>
    %71 = arith.addf %69, %70 : vector<8x128xf32>
    %72 = vector.extract_strided_slice %71 {offsets = [0, 0], sizes = [8, 96], strides = [1, 1]} : vector<8x128xf32> to vector<8x96xf32>
    %73 = arith.negf %72 : vector<8x96xf32>
    %74 = math.exp %73 : vector<8x96xf32>
    %cst_19 = arith.constant 1.000000e+00 : f32
    %75 = vector.broadcast %cst_19 : f32 to vector<8x96xf32>
    %76 = arith.addf %75, %74 : vector<8x96xf32>
    %77 = arith.divf %75, %76 : vector<8x96xf32>
    %78 = vector.extract_strided_slice %71 {offsets = [0, 96], sizes = [8, 32], strides = [1, 1]} : vector<8x128xf32> to vector<8x32xf32>
    %79 = math.tanh %78 : vector<8x32xf32>
    %80 = vector.extract_strided_slice %77 {offsets = [0, 0], sizes = [8, 32], strides = [1, 1]} : vector<8x96xf32> to vector<8x32xf32>
    %81 = vector.extract_strided_slice %77 {offsets = [0, 32], sizes = [8, 32], strides = [1, 1]} : vector<8x96xf32> to vector<8x32xf32>
    %82 = vector.extract_strided_slice %77 {offsets = [0, 64], sizes = [8, 32], strides = [1, 1]} : vector<8x96xf32> to vector<8x32xf32>
    %83 = arith.mulf %81, %64 : vector<8x32xf32>
    %84 = arith.mulf %80, %79 : vector<8x32xf32>
    %85 = arith.addf %83, %84 : vector<8x32xf32>
    %86 = math.tanh %85 : vector<8x32xf32>
    %87 = arith.mulf %82, %86 : vector<8x32xf32>
    %c4_i32 = arith.constant 4 : i32
    %88 = arith.index_cast %c4_i32 : i32 to index
    %c0_20 = arith.constant 0 : index
    %c0_21 = arith.constant 0 : index
    %89 = vector.load %arg1[%88, %c0_20, %c0_21] : memref<8x8x128xf32, #tpu.memory_space<vmem>>, vector<1x8x128xf32>
    %90 = vector.shape_cast %89 : vector<1x8x128xf32> to vector<8x128xf32>
    %cst_22 = arith.constant dense<0.000000e+00> : vector<8x128xf32>
    %91 = tpu.matmul %87, %0, %cst_22 {dimension_numbers = #tpu.dot_dimension_numbers<[1], [0], [0], [1], [0, 0, 1, 1], [], []>} : vector<8x32xf32>, vector<32x128xf32>, vector<8x128xf32> -> vector<8x128xf32>
    %92 = arith.addf %90, %91 : vector<8x128xf32>
    %93 = vector.extract_strided_slice %92 {offsets = [0, 0], sizes = [8, 96], strides = [1, 1]} : vector<8x128xf32> to vector<8x96xf32>
    %94 = arith.negf %93 : vector<8x96xf32>
    %95 = math.exp %94 : vector<8x96xf32>
    %cst_23 = arith.constant 1.000000e+00 : f32
    %96 = vector.broadcast %cst_23 : f32 to vector<8x96xf32>
    %97 = arith.addf %96, %95 : vector<8x96xf32>
    %98 = arith.divf %96, %97 : vector<8x96xf32>
    %99 = vector.extract_strided_slice %92 {offsets = [0, 96], sizes = [8, 32], strides = [1, 1]} : vector<8x128xf32> to vector<8x32xf32>
    %100 = math.tanh %99 : vector<8x32xf32>
    %101 = vector.extract_strided_slice %98 {offsets = [0, 0], sizes = [8, 32], strides = [1, 1]} : vector<8x96xf32> to vector<8x32xf32>
    %102 = vector.extract_strided_slice %98 {offsets = [0, 32], sizes = [8, 32], strides = [1, 1]} : vector<8x96xf32> to vector<8x32xf32>
    %103 = vector.extract_strided_slice %98 {offsets = [0, 64], sizes = [8, 32], strides = [1, 1]} : vector<8x96xf32> to vector<8x32xf32>
    %104 = arith.mulf %102, %85 : vector<8x32xf32>
    %105 = arith.mulf %101, %100 : vector<8x32xf32>
    %106 = arith.addf %104, %105 : vector<8x32xf32>
    %107 = math.tanh %106 : vector<8x32xf32>
    %108 = arith.mulf %103, %107 : vector<8x32xf32>
    %c5_i32 = arith.constant 5 : i32
    %109 = arith.index_cast %c5_i32 : i32 to index
    %c0_24 = arith.constant 0 : index
    %c0_25 = arith.constant 0 : index
    %110 = vector.load %arg1[%109, %c0_24, %c0_25] : memref<8x8x128xf32, #tpu.memory_space<vmem>>, vector<1x8x128xf32>
    %111 = vector.shape_cast %110 : vector<1x8x128xf32> to vector<8x128xf32>
    %cst_26 = arith.constant dense<0.000000e+00> : vector<8x128xf32>
    %112 = tpu.matmul %108, %0, %cst_26 {dimension_numbers = #tpu.dot_dimension_numbers<[1], [0], [0], [1], [0, 0, 1, 1], [], []>} : vector<8x32xf32>, vector<32x128xf32>, vector<8x128xf32> -> vector<8x128xf32>
    %113 = arith.addf %111, %112 : vector<8x128xf32>
    %114 = vector.extract_strided_slice %113 {offsets = [0, 0], sizes = [8, 96], strides = [1, 1]} : vector<8x128xf32> to vector<8x96xf32>
    %115 = arith.negf %114 : vector<8x96xf32>
    %116 = math.exp %115 : vector<8x96xf32>
    %cst_27 = arith.constant 1.000000e+00 : f32
    %117 = vector.broadcast %cst_27 : f32 to vector<8x96xf32>
    %118 = arith.addf %117, %116 : vector<8x96xf32>
    %119 = arith.divf %117, %118 : vector<8x96xf32>
    %120 = vector.extract_strided_slice %113 {offsets = [0, 96], sizes = [8, 32], strides = [1, 1]} : vector<8x128xf32> to vector<8x32xf32>
    %121 = math.tanh %120 : vector<8x32xf32>
    %122 = vector.extract_strided_slice %119 {offsets = [0, 0], sizes = [8, 32], strides = [1, 1]} : vector<8x96xf32> to vector<8x32xf32>
    %123 = vector.extract_strided_slice %119 {offsets = [0, 32], sizes = [8, 32], strides = [1, 1]} : vector<8x96xf32> to vector<8x32xf32>
    %124 = vector.extract_strided_slice %119 {offsets = [0, 64], sizes = [8, 32], strides = [1, 1]} : vector<8x96xf32> to vector<8x32xf32>
    %125 = arith.mulf %123, %106 : vector<8x32xf32>
    %126 = arith.mulf %122, %121 : vector<8x32xf32>
    %127 = arith.addf %125, %126 : vector<8x32xf32>
    %128 = math.tanh %127 : vector<8x32xf32>
    %129 = arith.mulf %124, %128 : vector<8x32xf32>
    %c6_i32 = arith.constant 6 : i32
    %130 = arith.index_cast %c6_i32 : i32 to index
    %c0_28 = arith.constant 0 : index
    %c0_29 = arith.constant 0 : index
    %131 = vector.load %arg1[%130, %c0_28, %c0_29] : memref<8x8x128xf32, #tpu.memory_space<vmem>>, vector<1x8x128xf32>
    %132 = vector.shape_cast %131 : vector<1x8x128xf32> to vector<8x128xf32>
    %cst_30 = arith.constant dense<0.000000e+00> : vector<8x128xf32>
    %133 = tpu.matmul %129, %0, %cst_30 {dimension_numbers = #tpu.dot_dimension_numbers<[1], [0], [0], [1], [0, 0, 1, 1], [], []>} : vector<8x32xf32>, vector<32x128xf32>, vector<8x128xf32> -> vector<8x128xf32>
    %134 = arith.addf %132, %133 : vector<8x128xf32>
    %135 = vector.extract_strided_slice %134 {offsets = [0, 0], sizes = [8, 96], strides = [1, 1]} : vector<8x128xf32> to vector<8x96xf32>
    %136 = arith.negf %135 : vector<8x96xf32>
    %137 = math.exp %136 : vector<8x96xf32>
    %cst_31 = arith.constant 1.000000e+00 : f32
    %138 = vector.broadcast %cst_31 : f32 to vector<8x96xf32>
    %139 = arith.addf %138, %137 : vector<8x96xf32>
    %140 = arith.divf %138, %139 : vector<8x96xf32>
    %141 = vector.extract_strided_slice %134 {offsets = [0, 96], sizes = [8, 32], strides = [1, 1]} : vector<8x128xf32> to vector<8x32xf32>
    %142 = math.tanh %141 : vector<8x32xf32>
    %143 = vector.extract_strided_slice %140 {offsets = [0, 0], sizes = [8, 32], strides = [1, 1]} : vector<8x96xf32> to vector<8x32xf32>
    %144 = vector.extract_strided_slice %140 {offsets = [0, 32], sizes = [8, 32], strides = [1, 1]} : vector<8x96xf32> to vector<8x32xf32>
    %145 = vector.extract_strided_slice %140 {offsets = [0, 64], sizes = [8, 32], strides = [1, 1]} : vector<8x96xf32> to vector<8x32xf32>
    %146 = arith.mulf %144, %127 : vector<8x32xf32>
    %147 = arith.mulf %143, %142 : vector<8x32xf32>
    %148 = arith.addf %146, %147 : vector<8x32xf32>
    %149 = math.tanh %148 : vector<8x32xf32>
    %150 = arith.mulf %145, %149 : vector<8x32xf32>
    %c7_i32 = arith.constant 7 : i32
    %151 = arith.index_cast %c7_i32 : i32 to index
    %c0_32 = arith.constant 0 : index
    %c0_33 = arith.constant 0 : index
    %152 = vector.load %arg1[%151, %c0_32, %c0_33] : memref<8x8x128xf32, #tpu.memory_space<vmem>>, vector<1x8x128xf32>
    %153 = vector.shape_cast %152 : vector<1x8x128xf32> to vector<8x128xf32>
    %cst_34 = arith.constant dense<0.000000e+00> : vector<8x128xf32>
    %154 = tpu.matmul %150, %0, %cst_34 {dimension_numbers = #tpu.dot_dimension_numbers<[1], [0], [0], [1], [0, 0, 1, 1], [], []>} : vector<8x32xf32>, vector<32x128xf32>, vector<8x128xf32> -> vector<8x128xf32>
    %155 = arith.addf %153, %154 : vector<8x128xf32>
    %156 = vector.extract_strided_slice %155 {offsets = [0, 0], sizes = [8, 96], strides = [1, 1]} : vector<8x128xf32> to vector<8x96xf32>
    %157 = arith.negf %156 : vector<8x96xf32>
    %158 = math.exp %157 : vector<8x96xf32>
    %cst_35 = arith.constant 1.000000e+00 : f32
    %159 = vector.broadcast %cst_35 : f32 to vector<8x96xf32>
    %160 = arith.addf %159, %158 : vector<8x96xf32>
    %161 = arith.divf %159, %160 : vector<8x96xf32>
    %162 = vector.extract_strided_slice %155 {offsets = [0, 96], sizes = [8, 32], strides = [1, 1]} : vector<8x128xf32> to vector<8x32xf32>
    %163 = math.tanh %162 : vector<8x32xf32>
    %164 = vector.extract_strided_slice %161 {offsets = [0, 0], sizes = [8, 32], strides = [1, 1]} : vector<8x96xf32> to vector<8x32xf32>
    %165 = vector.extract_strided_slice %161 {offsets = [0, 32], sizes = [8, 32], strides = [1, 1]} : vector<8x96xf32> to vector<8x32xf32>
    %166 = vector.extract_strided_slice %161 {offsets = [0, 64], sizes = [8, 32], strides = [1, 1]} : vector<8x96xf32> to vector<8x32xf32>
    %167 = arith.mulf %165, %148 : vector<8x32xf32>
    %168 = arith.mulf %164, %163 : vector<8x32xf32>
    %169 = arith.addf %167, %168 : vector<8x32xf32>
    %170 = math.tanh %169 : vector<8x32xf32>
    %171 = arith.mulf %166, %170 : vector<8x32xf32>
    %c8_i32 = arith.constant 8 : i32
    %c0_i32_36 = arith.constant 0 : i32
    %172 = arith.index_cast %c0_i32_36 : i32 to index
    %c0_37 = arith.constant 0 : index
    %c0_38 = arith.constant 0 : index
    %173 = vector.load %arg2[%172, %c0_37, %c0_38] : memref<8x8x128xf32, #tpu.memory_space<vmem>>, vector<1x8x128xf32>
    %174 = vector.shape_cast %173 : vector<1x8x128xf32> to vector<8x128xf32>
    %cst_39 = arith.constant dense<0.000000e+00> : vector<8x128xf32>
    %175 = tpu.matmul %171, %1, %cst_39 {dimension_numbers = #tpu.dot_dimension_numbers<[1], [0], [0], [1], [0, 0, 1, 1], [], []>} : vector<8x32xf32>, vector<32x128xf32>, vector<8x128xf32> -> vector<8x128xf32>
    %176 = arith.addf %174, %175 : vector<8x128xf32>
    %177 = vector.extract_strided_slice %176 {offsets = [0, 0], sizes = [8, 96], strides = [1, 1]} : vector<8x128xf32> to vector<8x96xf32>
    %178 = arith.negf %177 : vector<8x96xf32>
    %179 = math.exp %178 : vector<8x96xf32>
    %cst_40 = arith.constant 1.000000e+00 : f32
    %180 = vector.broadcast %cst_40 : f32 to vector<8x96xf32>
    %181 = arith.addf %180, %179 : vector<8x96xf32>
    %182 = arith.divf %180, %181 : vector<8x96xf32>
    %183 = vector.extract_strided_slice %176 {offsets = [0, 96], sizes = [8, 32], strides = [1, 1]} : vector<8x128xf32> to vector<8x32xf32>
    %184 = math.tanh %183 : vector<8x32xf32>
    %185 = vector.extract_strided_slice %182 {offsets = [0, 0], sizes = [8, 32], strides = [1, 1]} : vector<8x96xf32> to vector<8x32xf32>
    %186 = vector.extract_strided_slice %182 {offsets = [0, 32], sizes = [8, 32], strides = [1, 1]} : vector<8x96xf32> to vector<8x32xf32>
    %187 = vector.extract_strided_slice %182 {offsets = [0, 64], sizes = [8, 32], strides = [1, 1]} : vector<8x96xf32> to vector<8x32xf32>
    %188 = arith.mulf %186, %169 : vector<8x32xf32>
    %189 = arith.mulf %185, %184 : vector<8x32xf32>
    %190 = arith.addf %188, %189 : vector<8x32xf32>
    %191 = math.tanh %190 : vector<8x32xf32>
    %192 = arith.mulf %187, %191 : vector<8x32xf32>
    %193 = arith.index_cast %c0_i32_36 : i32 to index
    %c0_41 = arith.constant 0 : index
    %c0_42 = arith.constant 0 : index
    %194 = vector.load %arg5[%193, %c0_41, %c0_42] : memref<8x8x32xf32, #tpu.memory_space<vmem>>, vector<1x8x32xf32>
    %195 = vector.shape_cast %194 : vector<1x8x32xf32> to vector<8x32xf32>
    %196 = vector.shape_cast %192 : vector<8x32xf32> to vector<1x8x32xf32>
    tpu.vector_store %arg5[%193, %c0_41, %c0_42], %196 {strides = array<i32>} : memref<8x8x32xf32, #tpu.memory_space<vmem>>, vector<1x8x32xf32>,
    %c1_i32_43 = arith.constant 1 : i32
    %197 = arith.index_cast %c1_i32_43 : i32 to index
    %c0_44 = arith.constant 0 : index
    %c0_45 = arith.constant 0 : index
    %198 = vector.load %arg2[%197, %c0_44, %c0_45] : memref<8x8x128xf32, #tpu.memory_space<vmem>>, vector<1x8x128xf32>
    %199 = vector.shape_cast %198 : vector<1x8x128xf32> to vector<8x128xf32>
    %cst_46 = arith.constant dense<0.000000e+00> : vector<8x128xf32>
    %200 = tpu.matmul %192, %1, %cst_46 {dimension_numbers = #tpu.dot_dimension_numbers<[1], [0], [0], [1], [0, 0, 1, 1], [], []>} : vector<8x32xf32>, vector<32x128xf32>, vector<8x128xf32> -> vector<8x128xf32>
    %201 = arith.addf %199, %200 : vector<8x128xf32>
    %202 = vector.extract_strided_slice %201 {offsets = [0, 0], sizes = [8, 96], strides = [1, 1]} : vector<8x128xf32> to vector<8x96xf32>
    %203 = arith.negf %202 : vector<8x96xf32>
    %204 = math.exp %203 : vector<8x96xf32>
    %cst_47 = arith.constant 1.000000e+00 : f32
    %205 = vector.broadcast %cst_47 : f32 to vector<8x96xf32>
    %206 = arith.addf %205, %204 : vector<8x96xf32>
    %207 = arith.divf %205, %206 : vector<8x96xf32>
    %208 = vector.extract_strided_slice %201 {offsets = [0, 96], sizes = [8, 32], strides = [1, 1]} : vector<8x128xf32> to vector<8x32xf32>
    %209 = math.tanh %208 : vector<8x32xf32>
    %210 = vector.extract_strided_slice %207 {offsets = [0, 0], sizes = [8, 32], strides = [1, 1]} : vector<8x96xf32> to vector<8x32xf32>
    %211 = vector.extract_strided_slice %207 {offsets = [0, 32], sizes = [8, 32], strides = [1, 1]} : vector<8x96xf32> to vector<8x32xf32>
    %212 = vector.extract_strided_slice %207 {offsets = [0, 64], sizes = [8, 32], strides = [1, 1]} : vector<8x96xf32> to vector<8x32xf32>
    %213 = arith.mulf %211, %190 : vector<8x32xf32>
    %214 = arith.mulf %210, %209 : vector<8x32xf32>
    %215 = arith.addf %213, %214 : vector<8x32xf32>
    %216 = math.tanh %215 : vector<8x32xf32>
    %217 = arith.mulf %212, %216 : vector<8x32xf32>
    %218 = arith.index_cast %c1_i32_43 : i32 to index
    %c0_48 = arith.constant 0 : index
    %c0_49 = arith.constant 0 : index
    %219 = vector.load %arg5[%218, %c0_48, %c0_49] : memref<8x8x32xf32, #tpu.memory_space<vmem>>, vector<1x8x32xf32>
    %220 = vector.shape_cast %219 : vector<1x8x32xf32> to vector<8x32xf32>
    %221 = vector.shape_cast %217 : vector<8x32xf32> to vector<1x8x32xf32>
    tpu.vector_store %arg5[%218, %c0_48, %c0_49], %221 {strides = array<i32>} : memref<8x8x32xf32, #tpu.memory_space<vmem>>, vector<1x8x32xf32>,
    %c2_i32_50 = arith.constant 2 : i32
    %222 = arith.index_cast %c2_i32_50 : i32 to index
    %c0_51 = arith.constant 0 : index
    %c0_52 = arith.constant 0 : index
    %223 = vector.load %arg2[%222, %c0_51, %c0_52] : memref<8x8x128xf32, #tpu.memory_space<vmem>>, vector<1x8x128xf32>
    %224 = vector.shape_cast %223 : vector<1x8x128xf32> to vector<8x128xf32>
    %cst_53 = arith.constant dense<0.000000e+00> : vector<8x128xf32>
    %225 = tpu.matmul %217, %1, %cst_53 {dimension_numbers = #tpu.dot_dimension_numbers<[1], [0], [0], [1], [0, 0, 1, 1], [], []>} : vector<8x32xf32>, vector<32x128xf32>, vector<8x128xf32> -> vector<8x128xf32>
    %226 = arith.addf %224, %225 : vector<8x128xf32>
    %227 = vector.extract_strided_slice %226 {offsets = [0, 0], sizes = [8, 96], strides = [1, 1]} : vector<8x128xf32> to vector<8x96xf32>
    %228 = arith.negf %227 : vector<8x96xf32>
    %229 = math.exp %228 : vector<8x96xf32>
    %cst_54 = arith.constant 1.000000e+00 : f32
    %230 = vector.broadcast %cst_54 : f32 to vector<8x96xf32>
    %231 = arith.addf %230, %229 : vector<8x96xf32>
    %232 = arith.divf %230, %231 : vector<8x96xf32>
    %233 = vector.extract_strided_slice %226 {offsets = [0, 96], sizes = [8, 32], strides = [1, 1]} : vector<8x128xf32> to vector<8x32xf32>
    %234 = math.tanh %233 : vector<8x32xf32>
    %235 = vector.extract_strided_slice %232 {offsets = [0, 0], sizes = [8, 32], strides = [1, 1]} : vector<8x96xf32> to vector<8x32xf32>
    %236 = vector.extract_strided_slice %232 {offsets = [0, 32], sizes = [8, 32], strides = [1, 1]} : vector<8x96xf32> to vector<8x32xf32>
    %237 = vector.extract_strided_slice %232 {offsets = [0, 64], sizes = [8, 32], strides = [1, 1]} : vector<8x96xf32> to vector<8x32xf32>
    %238 = arith.mulf %236, %215 : vector<8x32xf32>
    %239 = arith.mulf %235, %234 : vector<8x32xf32>
    %240 = arith.addf %238, %239 : vector<8x32xf32>
    %241 = math.tanh %240 : vector<8x32xf32>
    %242 = arith.mulf %237, %241 : vector<8x32xf32>
    %243 = arith.index_cast %c2_i32_50 : i32 to index
    %c0_55 = arith.constant 0 : index
    %c0_56 = arith.constant 0 : index
    %244 = vector.load %arg5[%243, %c0_55, %c0_56] : memref<8x8x32xf32, #tpu.memory_space<vmem>>, vector<1x8x32xf32>
    %245 = vector.shape_cast %244 : vector<1x8x32xf32> to vector<8x32xf32>
    %246 = vector.shape_cast %242 : vector<8x32xf32> to vector<1x8x32xf32>
    tpu.vector_store %arg5[%243, %c0_55, %c0_56], %246 {strides = array<i32>} : memref<8x8x32xf32, #tpu.memory_space<vmem>>, vector<1x8x32xf32>,
    %c3_i32_57 = arith.constant 3 : i32
    %247 = arith.index_cast %c3_i32_57 : i32 to index
    %c0_58 = arith.constant 0 : index
    %c0_59 = arith.constant 0 : index
    %248 = vector.load %arg2[%247, %c0_58, %c0_59] : memref<8x8x128xf32, #tpu.memory_space<vmem>>, vector<1x8x128xf32>
    %249 = vector.shape_cast %248 : vector<1x8x128xf32> to vector<8x128xf32>
    %cst_60 = arith.constant dense<0.000000e+00> : vector<8x128xf32>
    %250 = tpu.matmul %242, %1, %cst_60 {dimension_numbers = #tpu.dot_dimension_numbers<[1], [0], [0], [1], [0, 0, 1, 1], [], []>} : vector<8x32xf32>, vector<32x128xf32>, vector<8x128xf32> -> vector<8x128xf32>
    %251 = arith.addf %249, %250 : vector<8x128xf32>
    %252 = vector.extract_strided_slice %251 {offsets = [0, 0], sizes = [8, 96], strides = [1, 1]} : vector<8x128xf32> to vector<8x96xf32>
    %253 = arith.negf %252 : vector<8x96xf32>
    %254 = math.exp %253 : vector<8x96xf32>
    %cst_61 = arith.constant 1.000000e+00 : f32
    %255 = vector.broadcast %cst_61 : f32 to vector<8x96xf32>
    %256 = arith.addf %255, %254 : vector<8x96xf32>
    %257 = arith.divf %255, %256 : vector<8x96xf32>
    %258 = vector.extract_strided_slice %251 {offsets = [0, 96], sizes = [8, 32], strides = [1, 1]} : vector<8x128xf32> to vector<8x32xf32>
    %259 = math.tanh %258 : vector<8x32xf32>
    %260 = vector.extract_strided_slice %257 {offsets = [0, 0], sizes = [8, 32], strides = [1, 1]} : vector<8x96xf32> to vector<8x32xf32>
    %261 = vector.extract_strided_slice %257 {offsets = [0, 32], sizes = [8, 32], strides = [1, 1]} : vector<8x96xf32> to vector<8x32xf32>
    %262 = vector.extract_strided_slice %257 {offsets = [0, 64], sizes = [8, 32], strides = [1, 1]} : vector<8x96xf32> to vector<8x32xf32>
    %263 = arith.mulf %261, %240 : vector<8x32xf32>
    %264 = arith.mulf %260, %259 : vector<8x32xf32>
    %265 = arith.addf %263, %264 : vector<8x32xf32>
    %266 = math.tanh %265 : vector<8x32xf32>
    %267 = arith.mulf %262, %266 : vector<8x32xf32>
    %268 = arith.index_cast %c3_i32_57 : i32 to index
    %c0_62 = arith.constant 0 : index
    %c0_63 = arith.constant 0 : index
    %269 = vector.load %arg5[%268, %c0_62, %c0_63] : memref<8x8x32xf32, #tpu.memory_space<vmem>>, vector<1x8x32xf32>
    %270 = vector.shape_cast %269 : vector<1x8x32xf32> to vector<8x32xf32>
    %271 = vector.shape_cast %267 : vector<8x32xf32> to vector<1x8x32xf32>
    tpu.vector_store %arg5[%268, %c0_62, %c0_63], %271 {strides = array<i32>} : memref<8x8x32xf32, #tpu.memory_space<vmem>>, vector<1x8x32xf32>,
    %c4_i32_64 = arith.constant 4 : i32
    %272 = arith.index_cast %c4_i32_64 : i32 to index
    %c0_65 = arith.constant 0 : index
    %c0_66 = arith.constant 0 : index
    %273 = vector.load %arg2[%272, %c0_65, %c0_66] : memref<8x8x128xf32, #tpu.memory_space<vmem>>, vector<1x8x128xf32>
    %274 = vector.shape_cast %273 : vector<1x8x128xf32> to vector<8x128xf32>
    %cst_67 = arith.constant dense<0.000000e+00> : vector<8x128xf32>
    %275 = tpu.matmul %267, %1, %cst_67 {dimension_numbers = #tpu.dot_dimension_numbers<[1], [0], [0], [1], [0, 0, 1, 1], [], []>} : vector<8x32xf32>, vector<32x128xf32>, vector<8x128xf32> -> vector<8x128xf32>
    %276 = arith.addf %274, %275 : vector<8x128xf32>
    %277 = vector.extract_strided_slice %276 {offsets = [0, 0], sizes = [8, 96], strides = [1, 1]} : vector<8x128xf32> to vector<8x96xf32>
    %278 = arith.negf %277 : vector<8x96xf32>
    %279 = math.exp %278 : vector<8x96xf32>
    %cst_68 = arith.constant 1.000000e+00 : f32
    %280 = vector.broadcast %cst_68 : f32 to vector<8x96xf32>
    %281 = arith.addf %280, %279 : vector<8x96xf32>
    %282 = arith.divf %280, %281 : vector<8x96xf32>
    %283 = vector.extract_strided_slice %276 {offsets = [0, 96], sizes = [8, 32], strides = [1, 1]} : vector<8x128xf32> to vector<8x32xf32>
    %284 = math.tanh %283 : vector<8x32xf32>
    %285 = vector.extract_strided_slice %282 {offsets = [0, 0], sizes = [8, 32], strides = [1, 1]} : vector<8x96xf32> to vector<8x32xf32>
    %286 = vector.extract_strided_slice %282 {offsets = [0, 32], sizes = [8, 32], strides = [1, 1]} : vector<8x96xf32> to vector<8x32xf32>
    %287 = vector.extract_strided_slice %282 {offsets = [0, 64], sizes = [8, 32], strides = [1, 1]} : vector<8x96xf32> to vector<8x32xf32>
    %288 = arith.mulf %286, %265 : vector<8x32xf32>
    %289 = arith.mulf %285, %284 : vector<8x32xf32>
    %290 = arith.addf %288, %289 : vector<8x32xf32>
    %291 = math.tanh %290 : vector<8x32xf32>
    %292 = arith.mulf %287, %291 : vector<8x32xf32>
    %293 = arith.index_cast %c4_i32_64 : i32 to index
    %c0_69 = arith.constant 0 : index
    %c0_70 = arith.constant 0 : index
    %294 = vector.load %arg5[%293, %c0_69, %c0_70] : memref<8x8x32xf32, #tpu.memory_space<vmem>>, vector<1x8x32xf32>
    %295 = vector.shape_cast %294 : vector<1x8x32xf32> to vector<8x32xf32>
    %296 = vector.shape_cast %292 : vector<8x32xf32> to vector<1x8x32xf32>
    tpu.vector_store %arg5[%293, %c0_69, %c0_70], %296 {strides = array<i32>} : memref<8x8x32xf32, #tpu.memory_space<vmem>>, vector<1x8x32xf32>,
    %c5_i32_71 = arith.constant 5 : i32
    %297 = arith.index_cast %c5_i32_71 : i32 to index
    %c0_72 = arith.constant 0 : index
    %c0_73 = arith.constant 0 : index
    %298 = vector.load %arg2[%297, %c0_72, %c0_73] : memref<8x8x128xf32, #tpu.memory_space<vmem>>, vector<1x8x128xf32>
    %299 = vector.shape_cast %298 : vector<1x8x128xf32> to vector<8x128xf32>
    %cst_74 = arith.constant dense<0.000000e+00> : vector<8x128xf32>
    %300 = tpu.matmul %292, %1, %cst_74 {dimension_numbers = #tpu.dot_dimension_numbers<[1], [0], [0], [1], [0, 0, 1, 1], [], []>} : vector<8x32xf32>, vector<32x128xf32>, vector<8x128xf32> -> vector<8x128xf32>
    %301 = arith.addf %299, %300 : vector<8x128xf32>
    %302 = vector.extract_strided_slice %301 {offsets = [0, 0], sizes = [8, 96], strides = [1, 1]} : vector<8x128xf32> to vector<8x96xf32>
    %303 = arith.negf %302 : vector<8x96xf32>
    %304 = math.exp %303 : vector<8x96xf32>
    %cst_75 = arith.constant 1.000000e+00 : f32
    %305 = vector.broadcast %cst_75 : f32 to vector<8x96xf32>
    %306 = arith.addf %305, %304 : vector<8x96xf32>
    %307 = arith.divf %305, %306 : vector<8x96xf32>
    %308 = vector.extract_strided_slice %301 {offsets = [0, 96], sizes = [8, 32], strides = [1, 1]} : vector<8x128xf32> to vector<8x32xf32>
    %309 = math.tanh %308 : vector<8x32xf32>
    %310 = vector.extract_strided_slice %307 {offsets = [0, 0], sizes = [8, 32], strides = [1, 1]} : vector<8x96xf32> to vector<8x32xf32>
    %311 = vector.extract_strided_slice %307 {offsets = [0, 32], sizes = [8, 32], strides = [1, 1]} : vector<8x96xf32> to vector<8x32xf32>
    %312 = vector.extract_strided_slice %307 {offsets = [0, 64], sizes = [8, 32], strides = [1, 1]} : vector<8x96xf32> to vector<8x32xf32>
    %313 = arith.mulf %311, %290 : vector<8x32xf32>
    %314 = arith.mulf %310, %309 : vector<8x32xf32>
    %315 = arith.addf %313, %314 : vector<8x32xf32>
    %316 = math.tanh %315 : vector<8x32xf32>
    %317 = arith.mulf %312, %316 : vector<8x32xf32>
    %318 = arith.index_cast %c5_i32_71 : i32 to index
    %c0_76 = arith.constant 0 : index
    %c0_77 = arith.constant 0 : index
    %319 = vector.load %arg5[%318, %c0_76, %c0_77] : memref<8x8x32xf32, #tpu.memory_space<vmem>>, vector<1x8x32xf32>
    %320 = vector.shape_cast %319 : vector<1x8x32xf32> to vector<8x32xf32>
    %321 = vector.shape_cast %317 : vector<8x32xf32> to vector<1x8x32xf32>
    tpu.vector_store %arg5[%318, %c0_76, %c0_77], %321 {strides = array<i32>} : memref<8x8x32xf32, #tpu.memory_space<vmem>>, vector<1x8x32xf32>,
    %c6_i32_78 = arith.constant 6 : i32
    %322 = arith.index_cast %c6_i32_78 : i32 to index
    %c0_79 = arith.constant 0 : index
    %c0_80 = arith.constant 0 : index
    %323 = vector.load %arg2[%322, %c0_79, %c0_80] : memref<8x8x128xf32, #tpu.memory_space<vmem>>, vector<1x8x128xf32>
    %324 = vector.shape_cast %323 : vector<1x8x128xf32> to vector<8x128xf32>
    %cst_81 = arith.constant dense<0.000000e+00> : vector<8x128xf32>
    %325 = tpu.matmul %317, %1, %cst_81 {dimension_numbers = #tpu.dot_dimension_numbers<[1], [0], [0], [1], [0, 0, 1, 1], [], []>} : vector<8x32xf32>, vector<32x128xf32>, vector<8x128xf32> -> vector<8x128xf32>
    %326 = arith.addf %324, %325 : vector<8x128xf32>
    %327 = vector.extract_strided_slice %326 {offsets = [0, 0], sizes = [8, 96], strides = [1, 1]} : vector<8x128xf32> to vector<8x96xf32>
    %328 = arith.negf %327 : vector<8x96xf32>
    %329 = math.exp %328 : vector<8x96xf32>
    %cst_82 = arith.constant 1.000000e+00 : f32
    %330 = vector.broadcast %cst_82 : f32 to vector<8x96xf32>
    %331 = arith.addf %330, %329 : vector<8x96xf32>
    %332 = arith.divf %330, %331 : vector<8x96xf32>
    %333 = vector.extract_strided_slice %326 {offsets = [0, 96], sizes = [8, 32], strides = [1, 1]} : vector<8x128xf32> to vector<8x32xf32>
    %334 = math.tanh %333 : vector<8x32xf32>
    %335 = vector.extract_strided_slice %332 {offsets = [0, 0], sizes = [8, 32], strides = [1, 1]} : vector<8x96xf32> to vector<8x32xf32>
    %336 = vector.extract_strided_slice %332 {offsets = [0, 32], sizes = [8, 32], strides = [1, 1]} : vector<8x96xf32> to vector<8x32xf32>
    %337 = vector.extract_strided_slice %332 {offsets = [0, 64], sizes = [8, 32], strides = [1, 1]} : vector<8x96xf32> to vector<8x32xf32>
    %338 = arith.mulf %336, %315 : vector<8x32xf32>
    %339 = arith.mulf %335, %334 : vector<8x32xf32>
    %340 = arith.addf %338, %339 : vector<8x32xf32>
    %341 = math.tanh %340 : vector<8x32xf32>
    %342 = arith.mulf %337, %341 : vector<8x32xf32>
    %343 = arith.index_cast %c6_i32_78 : i32 to index
    %c0_83 = arith.constant 0 : index
    %c0_84 = arith.constant 0 : index
    %344 = vector.load %arg5[%343, %c0_83, %c0_84] : memref<8x8x32xf32, #tpu.memory_space<vmem>>, vector<1x8x32xf32>
    %345 = vector.shape_cast %344 : vector<1x8x32xf32> to vector<8x32xf32>
    %346 = vector.shape_cast %342 : vector<8x32xf32> to vector<1x8x32xf32>
    tpu.vector_store %arg5[%343, %c0_83, %c0_84], %346 {strides = array<i32>} : memref<8x8x32xf32, #tpu.memory_space<vmem>>, vector<1x8x32xf32>,
    %c7_i32_85 = arith.constant 7 : i32
    %347 = arith.index_cast %c7_i32_85 : i32 to index
    %c0_86 = arith.constant 0 : index
    %c0_87 = arith.constant 0 : index
    %348 = vector.load %arg2[%347, %c0_86, %c0_87] : memref<8x8x128xf32, #tpu.memory_space<vmem>>, vector<1x8x128xf32>
    %349 = vector.shape_cast %348 : vector<1x8x128xf32> to vector<8x128xf32>
    %cst_88 = arith.constant dense<0.000000e+00> : vector<8x128xf32>
    %350 = tpu.matmul %342, %1, %cst_88 {dimension_numbers = #tpu.dot_dimension_numbers<[1], [0], [0], [1], [0, 0, 1, 1], [], []>} : vector<8x32xf32>, vector<32x128xf32>, vector<8x128xf32> -> vector<8x128xf32>
    %351 = arith.addf %349, %350 : vector<8x128xf32>
    %352 = vector.extract_strided_slice %351 {offsets = [0, 0], sizes = [8, 96], strides = [1, 1]} : vector<8x128xf32> to vector<8x96xf32>
    %353 = arith.negf %352 : vector<8x96xf32>
    %354 = math.exp %353 : vector<8x96xf32>
    %cst_89 = arith.constant 1.000000e+00 : f32
    %355 = vector.broadcast %cst_89 : f32 to vector<8x96xf32>
    %356 = arith.addf %355, %354 : vector<8x96xf32>
    %357 = arith.divf %355, %356 : vector<8x96xf32>
    %358 = vector.extract_strided_slice %351 {offsets = [0, 96], sizes = [8, 32], strides = [1, 1]} : vector<8x128xf32> to vector<8x32xf32>
    %359 = math.tanh %358 : vector<8x32xf32>
    %360 = vector.extract_strided_slice %357 {offsets = [0, 0], sizes = [8, 32], strides = [1, 1]} : vector<8x96xf32> to vector<8x32xf32>
    %361 = vector.extract_strided_slice %357 {offsets = [0, 32], sizes = [8, 32], strides = [1, 1]} : vector<8x96xf32> to vector<8x32xf32>
    %362 = vector.extract_strided_slice %357 {offsets = [0, 64], sizes = [8, 32], strides = [1, 1]} : vector<8x96xf32> to vector<8x32xf32>
    %363 = arith.mulf %361, %340 : vector<8x32xf32>
    %364 = arith.mulf %360, %359 : vector<8x32xf32>
    %365 = arith.addf %363, %364 : vector<8x32xf32>
    %366 = math.tanh %365 : vector<8x32xf32>
    %367 = arith.mulf %362, %366 : vector<8x32xf32>
    %368 = arith.index_cast %c7_i32_85 : i32 to index
    %c0_90 = arith.constant 0 : index
    %c0_91 = arith.constant 0 : index
    %369 = vector.load %arg5[%368, %c0_90, %c0_91] : memref<8x8x32xf32, #tpu.memory_space<vmem>>, vector<1x8x32xf32>
    %370 = vector.shape_cast %369 : vector<1x8x32xf32> to vector<8x32xf32>
    %371 = vector.shape_cast %367 : vector<8x32xf32> to vector<1x8x32xf32>
    tpu.vector_store %arg5[%368, %c0_90, %c0_91], %371 {strides = array<i32>} : memref<8x8x32xf32, #tpu.memory_space<vmem>>, vector<1x8x32xf32>,
    %c8_i32_92 = arith.constant 8 : i32
    return
  }
  func.func @transform_0(%arg0: i32) -> (i32, i32, i32) {
    %c0_i32 = arith.constant 0 : i32
    %c0_i32_0 = arith.constant 0 : i32
    %c0_i32_1 = arith.constant 0 : i32
    return %c0_i32, %arg0, %c0_i32_0 : i32, i32, i32
  }
  func.func @transform_1(%arg0: i32) -> (i32, i32, i32) {
    %c0_i32 = arith.constant 0 : i32
    %c0_i32_0 = arith.constant 0 : i32
    %c0_i32_1 = arith.constant 0 : i32
    return %c0_i32, %arg0, %c0_i32_0 : i32, i32, i32
  }
  func.func @transform_2(%arg0: i32) -> (i32, i32) {
    %c0_i32 = arith.constant 0 : i32
    %c0_i32_0 = arith.constant 0 : i32
    %c0_i32_1 = arith.constant 0 : i32
    return %c0_i32, %c0_i32_0 : i32, i32
  }
  func.func @transform_3(%arg0: i32) -> (i32, i32) {
    %c0_i32 = arith.constant 0 : i32
    %c0_i32_0 = arith.constant 0 : i32
    %c0_i32_1 = arith.constant 0 : i32
    return %c0_i32, %c0_i32_0 : i32, i32
  }
  func.func @transform_4(%arg0: i32) -> (i32, i32, i32) {
    %c0_i32 = arith.constant 0 : i32
    %c0_i32_0 = arith.constant 0 : i32
    %c0_i32_1 = arith.constant 0 : i32
    return %c0_i32, %arg0, %c0_i32_0 : i32, i32, i32
  }
}

</mosaic_0001>

<bundles_post_ra>
// kernel: generator_forward.1
= control target key start
LH: loop header
LB: loop body
LE: loop exit
PB: predicated region body
PF: predicated region fallthrough
CT: control target
= control target key end

     0   :  { %v2124_v0 = vmov 0.0   ;;  %vm2125_vm0 = vmmov 0   ;;  %s2126_s24 = smov 32   ;;  %s2127_s25 = smov 64   ;;  %vm26_vm1 = vcmask 261120   ;;  %s2513_s2 = inlined_call_operand.vmem [shape: f32[32,128], index: 2, kind: input, shape index: {}]   ;;  %s2514_s0 = inlined_call_operand.vmem [shape: f32[8,8,128], index: 0, kind: input, shape index: {}]   ;;  %s2515_s3 = inlined_call_operand.vmem [shape: f32[32,128], index: 3, kind: input, shape index: {}]   ;;  %s2516_s1 = inlined_call_operand.vmem [shape: f32[8,8,128], index: 1, kind: input, shape index: {}]   ;;  %s2517_s4 = inlined_call_operand.vmem [shape: f32[8,8,32], index: 4, kind: output, shape index: {}]  }
   0x1   :  { %1816 = vmatprep.subr.mxu0 %v2124_v0  ;;  %v2157_v1 = vld [vmem:[%s2513_s2 + $0x18] sm:$0xff]  ;;  %v2162_v2 = vld [vmem:[%s2513_s2 + $0x10] sm:$0xff]  ;;  %1824 = vmatprep.mubr.msk.f32.mxu0 %vm2125_vm0, %v2124_v0  ;;  %v2172_v3 = vld [vmem:[%s2513_s2 + $0x8] sm:$0xff] }
   0x2   :  { %1817 = vmatpush3.msra.mxu0 %v2157_v1  ;;  %1827 = vmatprep.subr.mxu1 %v2124_v0  ;;  %v2181_v4 = vld [vmem:[%s2513_s2] sm:$0xff]  ;;  %v1685_v23 = vld [vmem:[%s2514_s0 + $0x8] sm:$0xff]  ;;  %v1688_v41 = vld [vmem:[%s2514_s0 + $0x10] sm:$0xff] }
   0x3   :  { %1818 = vmatprep.subr.mxu0 %v2124_v0  ;;  %1828 = vmatpush3.msra.mxu1 %v2157_v1  ;;  %v25_v5 = vld [vmem:[%s2514_s0] sm:$0xff]  ;;  %v1691_v59 = vld [vmem:[%s2514_s0 + $0x18] sm:$0xff] }
   0x4   :  { %1819 = vmatpush3.msra.mxu0 %v2162_v2  ;;  %1829 = vmatprep.subr.mxu1 %v2124_v0 }
   0x5   :  { %1820 = vmatprep.subr.mxu0 %v2124_v0  ;;  %1830 = vmatpush3.msra.mxu1 %v2162_v2 }
   0x6   :  { %1821 = vmatpush3.msra.mxu0 %v2172_v3  ;;  %1831 = vmatprep.subr.mxu1 %v2124_v0 }
   0x7   :  { %1822 = vmatprep.subr.mxu0 %v2124_v0  ;;  %1832 = vmatpush3.msra.mxu1 %v2172_v3 }
   0x8   :  { %1823 = vmatpush3.msra.mxu0 %v2181_v4  ;;  %1833 = vmatprep.subr.mxu1 %v2124_v0 }
   0x9   :  { %1825 = vmatmul.mubr.f32.vlgmr.msra.gmra.mxu0 %v2124_v0  ;;  %1834 = vmatpush3.msra.mxu1 %v2181_v4 }
   0xa   :  { %1835 = vmatprep.mubr.msk.f32.mxu1 %vm2125_vm0, %v2124_v0  ;;  %1838 = vmatprep.subr.mxu0 %v2124_v0 }
   0xb   :  { %1839 = vmatpush3.msra.mxu0 %v2157_v1  ;;  %1846 = vmatprep.mubr.msk.f32.mxu0 %vm2125_vm0, %v2124_v0 }
   0xc   :  { %1840 = vmatprep.subr.mxu0 %v2124_v0  ;;  %1849 = vmatprep.subr.mxu1 %v2124_v0 }
   0xd   :  { %1841 = vmatpush3.msra.mxu0 %v2162_v2 }
   0xe   :  { %1842 = vmatprep.subr.mxu0 %v2124_v0 }
   0xf   :  { %1843 = vmatpush3.msra.mxu0 %v2172_v3 }
  0x10   :  { %1844 = vmatprep.subr.mxu0 %v2124_v0 }
  0x11   :  { %1845 = vmatpush3.msra.mxu0 %v2181_v4 }
  0x12   :  { %1860 = vmatprep.subr.mxu0 %v2124_v0 }
  0xc9   :  { %v96_v6 = vpop.f32.mrf.mxu0 }
  0xca   :  { %v100_v7 = vadd.f32 %v96_v6, %v25_v5 }
  0xcb   :  { %v1826_v8 = vpop.f32.mrf.mxu0 }
  0xcc   :  { %1996 = vtanh.f32 %v100_v7  ;;  %v1684_v10 = vmul.f32 -1.442695, %v100_v7 }
  0xce   :  { %1998 = vpow2.f32 %v1684_v10 }
  0xd9   :  { %v1997_v9 = vpop.eup %1996 }
  0xda   :  { %110 = vrot.lane.b32.xlu0 %v1997_v9, %s2126_s24 }
  0xdb   :  { %v1999_v11 = vpop.eup %1998 }
  0xdc   :  { %v104_v12 = vadd.f32 1.0, %v1999_v11 }
  0xde   :  { %2000 = vrcp.f32 %v104_v12 }
  0xeb   :  { %v2001_v13 = vpop.eup %2000 }
  0xec   :  { %v108_v16 = vmul.f32 0.0, %v2001_v13 }
 0x14c   :  { %v111_v14 = vpop.permute.xlu0 %110 }
 0x14d   :  { %v113_v15 = vmul.f32 %v2001_v13, %v111_v14 }
 0x14f   :  { %115 = vrot.lane.b32.xlu0 %v113_v15, %s2126_s24 }
 0x1c1   :  { %v116_v17 = vpop.permute.xlu0 %115 }
 0x1c2   :  { %v118_v18 = vadd.f32 %v116_v17, %v108_v16 }
 0x1c4   :  { %2002 = vtanh.f32 %v118_v18 }
 0x1d1   :  { %v2003_v19 = vpop.eup %2002 }
 0x1d2   :  { %121 = vrot.lane.b32.xlu1 %v2003_v19, %s2126_s24 }
 0x244   :  { %v122_v20 = vpop.permute.xlu1 %121 }
 0x245   :  { %v124_v21 = vmul.f32 %v2001_v13, %v122_v20 }
 0x247   :  { %128 = vrot.lane.b32.xlu1 %v124_v21, %s2127_s25 }
 0x2b9   :  { %v129_v22 = vpop.permute.xlu1 %128 }
 0x2ba   :  { %1836 = vmatmul.mubr.msk.f32.vlgmr.msra.gmra.mxu1 %vm26_vm1, %v129_v22 }
 0x2bb   :  { %1850 = vmatpush3.msra.mxu1 %v2157_v1  ;;  %1857 = vmatprep.mubr.msk.f32.mxu1 %vm2125_vm0, %v2124_v0 }
 0x2bc   :  { %1851 = vmatprep.subr.mxu1 %v2124_v0 }
 0x2bd   :  { %1852 = vmatpush3.msra.mxu1 %v2162_v2 }
 0x2be   :  { %1853 = vmatprep.subr.mxu1 %v2124_v0 }
 0x2bf   :  { %1854 = vmatpush3.msra.mxu1 %v2172_v3 }
 0x2c0   :  { %1855 = vmatprep.subr.mxu1 %v2124_v0 }
 0x2c1   :  { %1856 = vmatpush3.msra.mxu1 %v2181_v4 }
 0x2c2   :  { %1871 = vmatprep.subr.mxu1 %v2124_v0 }
 0x37a   :  { %v198_v24 = vpop.f32.mrf.mxu1 }
 0x37b   :  { %v202_v25 = vadd.f32 %v1685_v23, %v198_v24 }
 0x37c   :  { %v1837_v26 = vpop.f32.mrf.mxu1 }
 0x37d   :  { %2004 = vtanh.f32 %v202_v25  ;;  %v1687_v28 = vmul.f32 -1.442695, %v202_v25 }
 0x37f   :  { %2006 = vpow2.f32 %v1687_v28 }
 0x38a   :  { %v2005_v27 = vpop.eup %2004 }
 0x38b   :  { %212 = vrot.lane.b32.xlu0 %v2005_v27, %s2126_s24 }
 0x38c   :  { %v2007_v29 = vpop.eup %2006 }
 0x38d   :  { %v206_v30 = vadd.f32 1.0, %v2007_v29 }
 0x38f   :  { %2008 = vrcp.f32 %v206_v30 }
 0x39c   :  { %v2009_v31 = vpop.eup %2008 }
 0x39d   :  { %v210_v34 = vmul.f32 %v2009_v31, %v118_v18  ;;  %v1694_v18 = vld [vmem:[%s2514_s0 + $0x20] sm:$0xff] }
 0x3fd   :  { %v213_v32 = vpop.permute.xlu0 %212 }
 0x3fe   :  { %v215_v33 = vmul.f32 %v2009_v31, %v213_v32 }
 0x400   :  { %217 = vrot.lane.b32.xlu1 %v215_v33, %s2126_s24 }
 0x472   :  { %v218_v35 = vpop.permute.xlu1 %217 }
 0x473   :  { %v220_v36 = vadd.f32 %v218_v35, %v210_v34 }
 0x475   :  { %2010 = vtanh.f32 %v220_v36 }
 0x482   :  { %v2011_v37 = vpop.eup %2010 }
 0x483   :  { %223 = vrot.lane.b32.xlu0 %v2011_v37, %s2126_s24 }
 0x4f5   :  { %v224_v38 = vpop.permute.xlu0 %223 }
 0x4f6   :  { %v226_v39 = vmul.f32 %v2009_v31, %v224_v38 }
 0x4f8   :  { %230 = vrot.lane.b32.xlu1 %v226_v39, %s2127_s25 }
 0x56a   :  { %v231_v40 = vpop.permute.xlu1 %230 }
 0x56b   :  { %1847 = vmatmul.mubr.msk.f32.vlgmr.msra.gmra.mxu0 %vm26_vm1, %v231_v40 }
 0x56c   :  { %1861 = vmatpush3.msra.mxu0 %v2157_v1  ;;  %1868 = vmatprep.mubr.msk.f32.mxu0 %vm2125_vm0, %v2124_v0 }
 0x56d   :  { %1862 = vmatprep.subr.mxu0 %v2124_v0 }
 0x56e   :  { %1863 = vmatpush3.msra.mxu0 %v2162_v2 }
 0x56f   :  { %1864 = vmatprep.subr.mxu0 %v2124_v0 }
 0x570   :  { %1865 = vmatpush3.msra.mxu0 %v2172_v3 }
 0x571   :  { %1866 = vmatprep.subr.mxu0 %v2124_v0 }
 0x572   :  { %1867 = vmatpush3.msra.mxu0 %v2181_v4 }
 0x573   :  { %1882 = vmatprep.subr.mxu0 %v2124_v0 }
 0x62b   :  { %v300_v42 = vpop.f32.mrf.mxu0 }
 0x62c   :  { %v304_v43 = vadd.f32 %v1688_v41, %v300_v42 }
 0x62d   :  { %v1848_v44 = vpop.f32.mrf.mxu0 }
 0x62e   :  { %2012 = vtanh.f32 %v304_v43  ;;  %v1690_v46 = vmul.f32 -1.442695, %v304_v43 }
 0x630   :  { %2014 = vpow2.f32 %v1690_v46 }
 0x63b   :  { %v2013_v45 = vpop.eup %2012 }
 0x63c   :  { %314 = vrot.lane.b32.xlu0 %v2013_v45, %s2126_s24 }
 0x63d   :  { %v2015_v47 = vpop.eup %2014 }
 0x63e   :  { %v308_v48 = vadd.f32 1.0, %v2015_v47 }
 0x640   :  { %2016 = vrcp.f32 %v308_v48 }
 0x64d   :  { %v2017_v49 = vpop.eup %2016 }
 0x64e   :  { %v312_v52 = vmul.f32 %v2017_v49, %v220_v36 }
 0x6ae   :  { %v315_v50 = vpop.permute.xlu0 %314 }
 0x6af   :  { %v317_v51 = vmul.f32 %v2017_v49, %v315_v50  ;;  %v1700_v50 = vld [vmem:[%s2514_s0 + $0x30] sm:$0xff] }
 0x6b1   :  { %319 = vrot.lane.b32.xlu1 %v317_v51, %s2126_s24 }
 0x723   :  { %v320_v53 = vpop.permute.xlu1 %319 }
 0x724   :  { %v322_v54 = vadd.f32 %v320_v53, %v312_v52 }
 0x726   :  { %2018 = vtanh.f32 %v322_v54 }
 0x733   :  { %v2019_v55 = vpop.eup %2018 }
 0x734   :  { %325 = vrot.lane.b32.xlu0 %v2019_v55, %s2126_s24 }
 0x7a6   :  { %v326_v56 = vpop.permute.xlu0 %325 }
 0x7a7   :  { %v328_v57 = vmul.f32 %v2017_v49, %v326_v56 }
 0x7a9   :  { %332 = vrot.lane.b32.xlu1 %v328_v57, %s2127_s25 }
 0x81b   :  { %v333_v58 = vpop.permute.xlu1 %332 }
 0x81c   :  { %1858 = vmatmul.mubr.msk.f32.vlgmr.msra.gmra.mxu1 %vm26_vm1, %v333_v58 }
 0x81d   :  { %1872 = vmatpush3.msra.mxu1 %v2157_v1  ;;  %1879 = vmatprep.mubr.msk.f32.mxu1 %vm2125_vm0, %v2124_v0 }
 0x81e   :  { %1873 = vmatprep.subr.mxu1 %v2124_v0 }
 0x81f   :  { %1874 = vmatpush3.msra.mxu1 %v2162_v2 }
 0x820   :  { %1875 = vmatprep.subr.mxu1 %v2124_v0 }
 0x821   :  { %1876 = vmatpush3.msra.mxu1 %v2172_v3 }
 0x822   :  { %1877 = vmatprep.subr.mxu1 %v2124_v0 }
 0x823   :  { %1878 = vmatpush3.msra.mxu1 %v2181_v4 }
 0x824   :  { %1893 = vmatprep.subr.mxu1 %v2124_v0 }
 0x8dc   :  { %v402_v60 = vpop.f32.mrf.mxu1 }
 0x8dd   :  { %v406_v61 = vadd.f32 %v1691_v59, %v402_v60 }
 0x8de   :  { %v1859_v62 = vpop.f32.mrf.mxu1 }
 0x8df   :  { %2020 = vtanh.f32 %v406_v61  ;;  %v1693_v5 = vmul.f32 -1.442695, %v406_v61 }
 0x8e1   :  { %2022 = vpow2.f32 %v1693_v5 }
 0x8ec   :  { %v2021_v63 = vpop.eup %2020 }
 0x8ed   :  { %416 = vrot.lane.b32.xlu0 %v2021_v63, %s2126_s24 }
 0x8ee   :  { %v2023_v6 = vpop.eup %2022 }
 0x8ef   :  { %v410_v7 = vadd.f32 1.0, %v2023_v6 }
 0x8f1   :  { %2024 = vrcp.f32 %v410_v7 }
 0x8fe   :  { %v2025_v8 = vpop.eup %2024 }
 0x8ff   :  { %v414_v11 = vmul.f32 %v2025_v8, %v322_v54 }
 0x95f   :  { %v417_v9 = vpop.permute.xlu0 %416 }
 0x960   :  { %v419_v10 = vmul.f32 %v2025_v8, %v417_v9  ;;  %v1703_v9 = vld [vmem:[%s2514_s0 + $0x38] sm:$0xff] }
 0x962   :  { %421 = vrot.lane.b32.xlu1 %v419_v10, %s2126_s24 }
 0x9d4   :  { %v422_v12 = vpop.permute.xlu1 %421 }
 0x9d5   :  { %v424_v13 = vadd.f32 %v422_v12, %v414_v11 }
 0x9d7   :  { %2026 = vtanh.f32 %v424_v13 }
 0x9e4   :  { %v2027_v14 = vpop.eup %2026 }
 0x9e5   :  { %427 = vrot.lane.b32.xlu0 %v2027_v14, %s2126_s24 }
 0xa57   :  { %v428_v15 = vpop.permute.xlu0 %427 }
 0xa58   :  { %v430_v16 = vmul.f32 %v2025_v8, %v428_v15 }
 0xa5a   :  { %434 = vrot.lane.b32.xlu1 %v430_v16, %s2127_s25 }
 0xacc   :  { %v435_v17 = vpop.permute.xlu1 %434 }
 0xacd   :  { %1869 = vmatmul.mubr.msk.f32.vlgmr.msra.gmra.mxu0 %vm26_vm1, %v435_v17 }
 0xace   :  { %1883 = vmatpush3.msra.mxu0 %v2157_v1  ;;  %1890 = vmatprep.mubr.msk.f32.mxu0 %vm2125_vm0, %v2124_v0 }
 0xacf   :  { %1884 = vmatprep.subr.mxu0 %v2124_v0 }
 0xad0   :  { %1885 = vmatpush3.msra.mxu0 %v2162_v2 }
 0xad1   :  { %1886 = vmatprep.subr.mxu0 %v2124_v0 }
 0xad2   :  { %1887 = vmatpush3.msra.mxu0 %v2172_v3 }
 0xad3   :  { %1888 = vmatprep.subr.mxu0 %v2124_v0 }
 0xad4   :  { %1889 = vmatpush3.msra.mxu0 %v2181_v4 }
 0xad5   :  { %1904 = vmatprep.subr.mxu0 %v2124_v0 }
 0xb8d   :  { %v504_v19 = vpop.f32.mrf.mxu0 }
 0xb8e   :  { %v508_v20 = vadd.f32 %v1694_v18, %v504_v19 }
 0xb8f   :  { %v1870_v21 = vpop.f32.mrf.mxu0 }
 0xb90   :  { %2028 = vtanh.f32 %v508_v20  ;;  %v1696_v23 = vmul.f32 -1.442695, %v508_v20 }
 0xb92   :  { %2030 = vpow2.f32 %v1696_v23  ;;  %v2324_v23 = vld [vmem:[%s2515_s3 + $0x18] sm:$0xff] }
 0xb9d   :  { %v2029_v22 = vpop.eup %2028 }
 0xb9e   :  { %518 = vrot.lane.b32.xlu0 %v2029_v22, %s2126_s24 }
 0xb9f   :  { %v2031_v24 = vpop.eup %2030 }
 0xba0   :  { %v512_v25 = vadd.f32 1.0, %v2031_v24  ;;  %v2329_v24 = vld [vmem:[%s2515_s3 + $0x10] sm:$0xff] }
 0xba2   :  { %2032 = vrcp.f32 %v512_v25  ;;  %v2337_v25 = vld [vmem:[%s2515_s3 + $0x8] sm:$0xff] }
 0xbaf   :  { %v2033_v26 = vpop.eup %2032 }
 0xbb0   :  { %v516_v29 = vmul.f32 %v2033_v26, %v424_v13 }
 0xc10   :  { %v519_v27 = vpop.permute.xlu0 %518 }
 0xc11   :  { %v521_v28 = vmul.f32 %v2033_v26, %v519_v27 }
 0xc13   :  { %523 = vrot.lane.b32.xlu1 %v521_v28, %s2126_s24 }
 0xc85   :  { %v524_v30 = vpop.permute.xlu1 %523 }
 0xc86   :  { %v526_v31 = vadd.f32 %v524_v30, %v516_v29 }
 0xc88   :  { %2034 = vtanh.f32 %v526_v31 }
 0xc95   :  { %v2035_v32 = vpop.eup %2034 }
 0xc96   :  { %529 = vrot.lane.b32.xlu0 %v2035_v32, %s2126_s24 }
 0xd08   :  { %v530_v33 = vpop.permute.xlu0 %529 }
 0xd09   :  { %v532_v34 = vmul.f32 %v2033_v26, %v530_v33  ;;  %v2346_v26 = vld [vmem:[%s2515_s3] sm:$0xff] }
 0xd0b   :  { %536 = vrot.lane.b32.xlu1 %v532_v34, %s2127_s25 }
 0xd7d   :  { %v537_v35 = vpop.permute.xlu1 %536 }
 0xd7e   :  { %1880 = vmatmul.mubr.msk.f32.vlgmr.msra.gmra.mxu1 %vm26_vm1, %v537_v35 }
 0xd7f   :  { %1894 = vmatpush3.msra.mxu1 %v2157_v1  ;;  %1901 = vmatprep.mubr.msk.f32.mxu1 %vm2125_vm0, %v2124_v0  ;;  %v1697_v1 = vld [vmem:[%s2514_s0 + $0x28] sm:$0xff] }
 0xd80   :  { %1895 = vmatprep.subr.mxu1 %v2124_v0 }
 0xd81   :  { %1896 = vmatpush3.msra.mxu1 %v2162_v2 }
 0xd82   :  { %1897 = vmatprep.subr.mxu1 %v2124_v0 }
 0xd83   :  { %1898 = vmatpush3.msra.mxu1 %v2172_v3 }
 0xd84   :  { %1899 = vmatprep.subr.mxu1 %v2124_v0 }
 0xd85   :  { %1900 = vmatpush3.msra.mxu1 %v2181_v4 }
 0xd86   :  { %1915 = vmatprep.subr.mxu1 %v2124_v0 }
 0xe3e   :  { %v606_v36 = vpop.f32.mrf.mxu1 }
 0xe3f   :  { %v610_v37 = vadd.f32 %v1697_v1, %v606_v36 }
 0xe40   :  { %v1881_v38 = vpop.f32.mrf.mxu1 }
 0xe41   :  { %2036 = vtanh.f32 %v610_v37  ;;  %v1699_v2 = vmul.f32 -1.442695, %v610_v37 }
 0xe43   :  { %2038 = vpow2.f32 %v1699_v2 }
 0xe4e   :  { %v2037_v39 = vpop.eup %2036 }
 0xe4f   :  { %620 = vrot.lane.b32.xlu0 %v2037_v39, %s2126_s24 }
 0xe50   :  { %v2039_v3 = vpop.eup %2038 }
 0xe51   :  { %v614_v40 = vadd.f32 1.0, %v2039_v3 }
 0xe53   :  { %2040 = vrcp.f32 %v614_v40 }
 0xe60   :  { %v2041_v41 = vpop.eup %2040 }
 0xe61   :  { %v618_v43 = vmul.f32 %v2041_v41, %v526_v31  ;;  %v839_v31 = vld [vmem:[%s2516_s1] sm:$0xff] }
 0xec1   :  { %v621_v4 = vpop.permute.xlu0 %620 }
 0xec2   :  { %v623_v42 = vmul.f32 %v2041_v41, %v621_v4 }
 0xec4   :  { %625 = vrot.lane.b32.xlu1 %v623_v42, %s2126_s24 }
 0xf36   :  { %v626_v44 = vpop.permute.xlu1 %625 }
 0xf37   :  { %v628_v45 = vadd.f32 %v626_v44, %v618_v43 }
 0xf39   :  { %2042 = vtanh.f32 %v628_v45 }
 0xf46   :  { %v2043_v46 = vpop.eup %2042 }
 0xf47   :  { %631 = vrot.lane.b32.xlu0 %v2043_v46, %s2126_s24 }
 0xfb9   :  { %v632_v47 = vpop.permute.xlu0 %631 }
 0xfba   :  { %v634_v48 = vmul.f32 %v2041_v41, %v632_v47 }
 0xfbc   :  { %638 = vrot.lane.b32.xlu1 %v634_v48, %s2127_s25 }
0x102e   :  { %v639_v49 = vpop.permute.xlu1 %638 }
0x102f   :  { %1891 = vmatmul.mubr.msk.f32.vlgmr.msra.gmra.mxu0 %vm26_vm1, %v639_v49 }
0x1030   :  { %1912 = vmatprep.mubr.msk.f32.mxu0 %vm2125_vm0, %v2124_v0  ;;  %1905 = vmatpush3.msra.mxu0 %v2324_v23 }
0x1031   :  { %1906 = vmatprep.subr.mxu0 %v2124_v0 }
0x1032   :  { %1907 = vmatpush3.msra.mxu0 %v2329_v24 }
0x1033   :  { %1908 = vmatprep.subr.mxu0 %v2124_v0 }
0x1034   :  { %1909 = vmatpush3.msra.mxu0 %v2337_v25 }
0x1035   :  { %1910 = vmatprep.subr.mxu0 %v2124_v0 }
0x1036   :  { %1911 = vmatpush3.msra.mxu0 %v2346_v26 }
0x1037   :  { %1926 = vmatprep.subr.mxu0 %v2124_v0 }
0x10ef   :  { %v708_v51 = vpop.f32.mrf.mxu0 }
0x10f0   :  { %v712_v52 = vadd.f32 %v1700_v50, %v708_v51 }
0x10f1   :  { %v1892_v53 = vpop.f32.mrf.mxu0 }
0x10f2   :  { %2044 = vtanh.f32 %v712_v52  ;;  %v1702_v55 = vmul.f32 -1.442695, %v712_v52 }
0x10f4   :  { %2046 = vpow2.f32 %v1702_v55 }
0x10ff   :  { %v2045_v54 = vpop.eup %2044 }
0x1100   :  { %722 = vrot.lane.b32.xlu0 %v2045_v54, %s2126_s24 }
0x1101   :  { %v2047_v56 = vpop.eup %2046 }
0x1102   :  { %v716_v57 = vadd.f32 1.0, %v2047_v56 }
0x1104   :  { %2048 = vrcp.f32 %v716_v57 }
0x1111   :  { %v2049_v58 = vpop.eup %2048 }
0x1112   :  { %v720_v61 = vmul.f32 %v2049_v58, %v628_v45  ;;  %v1708_v45 = vld [vmem:[%s2516_s1 + $0x8] sm:$0xff] }
0x1172   :  { %v723_v59 = vpop.permute.xlu0 %722 }
0x1173   :  { %v725_v60 = vmul.f32 %v2049_v58, %v723_v59 }
0x1175   :  { %727 = vrot.lane.b32.xlu1 %v725_v60, %s2126_s24 }
0x11e7   :  { %v728_v62 = vpop.permute.xlu1 %727 }
0x11e8   :  { %v730_v63 = vadd.f32 %v728_v62, %v720_v61 }
0x11ea   :  { %2050 = vtanh.f32 %v730_v63 }
0x11f7   :  { %v2051_v5 = vpop.eup %2050 }
0x11f8   :  { %733 = vrot.lane.b32.xlu0 %v2051_v5, %s2126_s24 }
0x126a   :  { %v734_v6 = vpop.permute.xlu0 %733 }
0x126b   :  { %v736_v7 = vmul.f32 %v2049_v58, %v734_v6 }
0x126d   :  { %740 = vrot.lane.b32.xlu1 %v736_v7, %s2127_s25 }
0x12df   :  { %v741_v8 = vpop.permute.xlu1 %740 }
0x12e0   :  { %1902 = vmatmul.mubr.msk.f32.vlgmr.msra.gmra.mxu1 %vm26_vm1, %v741_v8 }
0x12e1   :  { %1923 = vmatprep.mubr.msk.f32.mxu1 %vm2125_vm0, %v2124_v0  ;;  %1916 = vmatpush3.msra.mxu1 %v2324_v23 }
0x12e2   :  { %1917 = vmatprep.subr.mxu1 %v2124_v0 }
0x12e3   :  { %1918 = vmatpush3.msra.mxu1 %v2329_v24 }
0x12e4   :  { %1919 = vmatprep.subr.mxu1 %v2124_v0 }
0x12e5   :  { %1920 = vmatpush3.msra.mxu1 %v2337_v25 }
0x12e6   :  { %1921 = vmatprep.subr.mxu1 %v2124_v0 }
0x12e7   :  { %1922 = vmatpush3.msra.mxu1 %v2346_v26 }
0x12e8   :  { %1937 = vmatprep.subr.mxu1 %v2124_v0 }
0x13a0   :  { %v810_v10 = vpop.f32.mrf.mxu1 }
0x13a1   :  { %v814_v11 = vadd.f32 %v1703_v9, %v810_v10 }
0x13a2   :  { %v1903_v12 = vpop.f32.mrf.mxu1 }
0x13a3   :  { %2052 = vtanh.f32 %v814_v11  ;;  %v1705_v14 = vmul.f32 -1.442695, %v814_v11 }
0x13a5   :  { %2054 = vpow2.f32 %v1705_v14 }
0x13b0   :  { %v2053_v13 = vpop.eup %2052 }
0x13b1   :  { %824 = vrot.lane.b32.xlu0 %v2053_v13, %s2126_s24 }
0x13b2   :  { %v2055_v15 = vpop.eup %2054 }
0x13b3   :  { %v818_v16 = vadd.f32 1.0, %v2055_v15 }
0x13b5   :  { %2056 = vrcp.f32 %v818_v16 }
0x13c2   :  { %v2057_v17 = vpop.eup %2056 }
0x13c3   :  { %v822_v20 = vmul.f32 %v2057_v17, %v730_v63  ;;  %v1712_v63 = vld [vmem:[%s2516_s1 + $0x10] sm:$0xff] }
0x1423   :  { %v825_v18 = vpop.permute.xlu0 %824 }
0x1424   :  { %v827_v19 = vmul.f32 %v2057_v17, %v825_v18 }
0x1426   :  { %829 = vrot.lane.b32.xlu1 %v827_v19, %s2126_s24 }
0x1498   :  { %v830_v21 = vpop.permute.xlu1 %829 }
0x1499   :  { %v832_v22 = vadd.f32 %v830_v21, %v822_v20 }
0x149b   :  { %2058 = vtanh.f32 %v832_v22 }
0x14a8   :  { %v2059_v27 = vpop.eup %2058 }
0x14a9   :  { %835 = vrot.lane.b32.xlu0 %v2059_v27, %s2126_s24 }
0x151b   :  { %v836_v28 = vpop.permute.xlu0 %835 }
0x151c   :  { %v838_v29 = vmul.f32 %v2057_v17, %v836_v28 }
0x151e   :  { %841 = vrot.lane.b32.xlu1 %v838_v29, %s2127_s25 }
0x1590   :  { %v842_v30 = vpop.permute.xlu1 %841 }
0x1591   :  { %1913 = vmatmul.mubr.msk.f32.vlgmr.msra.gmra.mxu0 %vm26_vm1, %v842_v30 }
0x1592   :  { %1927 = vmatpush3.msra.mxu0 %v2324_v23  ;;  %1934 = vmatprep.mubr.msk.f32.mxu0 %vm2125_vm0, %v2124_v0 }
0x1593   :  { %1928 = vmatprep.subr.mxu0 %v2124_v0 }
0x1594   :  { %1929 = vmatpush3.msra.mxu0 %v2329_v24 }
0x1595   :  { %1930 = vmatprep.subr.mxu0 %v2124_v0 }
0x1596   :  { %1931 = vmatpush3.msra.mxu0 %v2337_v25 }
0x1597   :  { %1932 = vmatprep.subr.mxu0 %v2124_v0 }
0x1598   :  { %1933 = vmatpush3.msra.mxu0 %v2346_v26 }
0x1599   :  { %1948 = vmatprep.subr.mxu0 %v2124_v0 }
0x1651   :  { %v911_v32 = vpop.f32.mrf.mxu0 }
0x1652   :  { %v915_v33 = vadd.f32 %v911_v32, %v839_v31 }
0x1653   :  { %v1914_v34 = vpop.f32.mrf.mxu0 }
0x1654   :  { %2060 = vtanh.f32 %v915_v33  ;;  %v1707_v1 = vmul.f32 -1.442695, %v915_v33 }
0x1656   :  { %2062 = vpow2.f32 %v1707_v1 }
0x1661   :  { %v2061_v35 = vpop.eup %2060 }
0x1662   :  { %925 = vrot.lane.b32.xlu0 %v2061_v35, %s2126_s24 }
0x1663   :  { %v2063_v36 = vpop.eup %2062 }
0x1664   :  { %v919_v37 = vadd.f32 1.0, %v2063_v36 }
0x1666   :  { %2064 = vrcp.f32 %v919_v37 }
0x1673   :  { %v2065_v38 = vpop.eup %2064 }
0x1674   :  { %v923_v3 = vmul.f32 %v2065_v38, %v832_v22  ;;  %v1716_v22 = vld [vmem:[%s2516_s1 + $0x18] sm:$0xff] }
0x16d4   :  { %v926_v39 = vpop.permute.xlu0 %925 }
0x16d5   :  { %v928_v2 = vmul.f32 %v2065_v38, %v926_v39 }
0x16d7   :  { %930 = vrot.lane.b32.xlu1 %v928_v2, %s2126_s24 }
0x1749   :  { %v931_v40 = vpop.permute.xlu1 %930 }
0x174a   :  { %v933_v41 = vadd.f32 %v931_v40, %v923_v3 }
0x174c   :  { %2066 = vtanh.f32 %v933_v41 }
0x1759   :  { %v2067_v4 = vpop.eup %2066 }
0x175a   :  { %936 = vrot.lane.b32.xlu0 %v2067_v4, %s2126_s24 }
0x17cc   :  { %v937_v42 = vpop.permute.xlu0 %936 }
0x17cd   :  { %v939_v43 = vmul.f32 %v2065_v38, %v937_v42 }
0x17cf   :  { %941 = vrot.lane.b32.xlu1 %v939_v43, %s2127_s25 }
0x1841   :  { %v942_v44 = vpop.permute.xlu1 %941 }
0x1842   :  { %944 = vst.msk [vmem:[%s2517_s4] sm:$0xff] %vm26_vm1, %v942_v44  ;;  %1924 = vmatmul.mubr.msk.f32.vlgmr.msra.gmra.mxu1 %vm26_vm1, %v942_v44 }
0x1843   :  { %1938 = vmatpush3.msra.mxu1 %v2324_v23  ;;  %1945 = vmatprep.mubr.msk.f32.mxu1 %vm2125_vm0, %v2124_v0 }
0x1844   :  { %1939 = vmatprep.subr.mxu1 %v2124_v0 }
0x1845   :  { %1940 = vmatpush3.msra.mxu1 %v2329_v24 }
0x1846   :  { %1941 = vmatprep.subr.mxu1 %v2124_v0 }
0x1847   :  { %1942 = vmatpush3.msra.mxu1 %v2337_v25 }
0x1848   :  { %1943 = vmatprep.subr.mxu1 %v2124_v0 }
0x1849   :  { %1944 = vmatpush3.msra.mxu1 %v2346_v26 }
0x184a   :  { %1959 = vmatprep.subr.mxu1 %v2124_v0 }
0x1902   :  { %v1015_v46 = vpop.f32.mrf.mxu1 }
0x1903   :  { %v1019_v47 = vadd.f32 %v1708_v45, %v1015_v46 }
0x1904   :  { %v1925_v48 = vpop.f32.mrf.mxu1 }
0x1905   :  { %2068 = vtanh.f32 %v1019_v47  ;;  %v1710_v50 = vmul.f32 -1.442695, %v1019_v47 }
0x1907   :  { %2070 = vpow2.f32 %v1710_v50 }
0x1912   :  { %v2069_v49 = vpop.eup %2068 }
0x1913   :  { %1029 = vrot.lane.b32.xlu0 %v2069_v49, %s2126_s24 }
0x1914   :  { %v2071_v51 = vpop.eup %2070 }
0x1915   :  { %v1023_v52 = vadd.f32 1.0, %v2071_v51 }
0x1917   :  { %2072 = vrcp.f32 %v1023_v52 }
0x1924   :  { %v2073_v53 = vpop.eup %2072 }
0x1925   :  { %v1027_v56 = vmul.f32 %v2073_v53, %v933_v41  ;;  %v1720_v41 = vld [vmem:[%s2516_s1 + $0x20] sm:$0xff] }
0x1985   :  { %v1030_v54 = vpop.permute.xlu0 %1029 }
0x1986   :  { %v1032_v55 = vmul.f32 %v2073_v53, %v1030_v54 }
0x1988   :  { %1034 = vrot.lane.b32.xlu1 %v1032_v55, %s2126_s24 }
0x19fa   :  { %v1035_v57 = vpop.permute.xlu1 %1034 }
0x19fb   :  { %v1037_v58 = vadd.f32 %v1035_v57, %v1027_v56 }
0x19fd   :  { %2074 = vtanh.f32 %v1037_v58 }
0x1a0a   :  { %v2075_v59 = vpop.eup %2074 }
0x1a0b   :  { %1040 = vrot.lane.b32.xlu0 %v2075_v59, %s2126_s24 }
0x1a7d   :  { %v1041_v60 = vpop.permute.xlu0 %1040 }
0x1a7e   :  { %v1043_v61 = vmul.f32 %v2073_v53, %v1041_v60 }
0x1a80   :  { %1045 = vrot.lane.b32.xlu1 %v1043_v61, %s2127_s25 }
0x1af2   :  { %v1046_v62 = vpop.permute.xlu1 %1045 }
0x1af3   :  { %1711 = vst.msk [vmem:[%s2517_s4 + $0x8] sm:$0xff] %vm26_vm1, %v1046_v62  ;;  %1935 = vmatmul.mubr.msk.f32.vlgmr.msra.gmra.mxu0 %vm26_vm1, %v1046_v62 }
0x1af4   :  { %1949 = vmatpush3.msra.mxu0 %v2324_v23  ;;  %1956 = vmatprep.mubr.msk.f32.mxu0 %vm2125_vm0, %v2124_v0 }
0x1af5   :  { %1950 = vmatprep.subr.mxu0 %v2124_v0 }
0x1af6   :  { %1951 = vmatpush3.msra.mxu0 %v2329_v24 }
0x1af7   :  { %1952 = vmatprep.subr.mxu0 %v2124_v0 }
0x1af8   :  { %1953 = vmatpush3.msra.mxu0 %v2337_v25 }
0x1af9   :  { %1954 = vmatprep.subr.mxu0 %v2124_v0 }
0x1afa   :  { %1955 = vmatpush3.msra.mxu0 %v2346_v26 }
0x1afb   :  { %1970 = vmatprep.subr.mxu0 %v2124_v0 }
0x1bb3   :  { %v1120_v5 = vpop.f32.mrf.mxu0 }
0x1bb4   :  { %v1124_v6 = vadd.f32 %v1712_v63, %v1120_v5 }
0x1bb5   :  { %v1936_v7 = vpop.f32.mrf.mxu0 }
0x1bb6   :  { %2076 = vtanh.f32 %v1124_v6  ;;  %v1714_v9 = vmul.f32 -1.442695, %v1124_v6 }
0x1bb8   :  { %2078 = vpow2.f32 %v1714_v9 }
0x1bc3   :  { %v2077_v8 = vpop.eup %2076 }
0x1bc4   :  { %1134 = vrot.lane.b32.xlu0 %v2077_v8, %s2126_s24 }
0x1bc5   :  { %v2079_v10 = vpop.eup %2078 }
0x1bc6   :  { %v1128_v11 = vadd.f32 1.0, %v2079_v10 }
0x1bc8   :  { %2080 = vrcp.f32 %v1128_v11 }
0x1bd5   :  { %v2081_v12 = vpop.eup %2080 }
0x1bd6   :  { %v1132_v15 = vmul.f32 %v2081_v12, %v1037_v58  ;;  %v1724_v58 = vld [vmem:[%s2516_s1 + $0x28] sm:$0xff] }
0x1c36   :  { %v1135_v13 = vpop.permute.xlu0 %1134 }
0x1c37   :  { %v1137_v14 = vmul.f32 %v2081_v12, %v1135_v13 }
0x1c39   :  { %1139 = vrot.lane.b32.xlu1 %v1137_v14, %s2126_s24 }
0x1cab   :  { %v1140_v16 = vpop.permute.xlu1 %1139 }
0x1cac   :  { %v1142_v17 = vadd.f32 %v1140_v16, %v1132_v15 }
0x1cae   :  { %2082 = vtanh.f32 %v1142_v17 }
0x1cbb   :  { %v2083_v18 = vpop.eup %2082 }
0x1cbc   :  { %1145 = vrot.lane.b32.xlu0 %v2083_v18, %s2126_s24 }
0x1d2e   :  { %v1146_v19 = vpop.permute.xlu0 %1145 }
0x1d2f   :  { %v1148_v20 = vmul.f32 %v2081_v12, %v1146_v19  ;;  %v1728_v12 = vld [vmem:[%s2516_s1 + $0x30] sm:$0xff] }
0x1d31   :  { %1150 = vrot.lane.b32.xlu1 %v1148_v20, %s2127_s25 }
0x1da3   :  { %v1151_v21 = vpop.permute.xlu1 %1150 }
0x1da4   :  { %1715 = vst.msk [vmem:[%s2517_s4 + $0x10] sm:$0xff] %vm26_vm1, %v1151_v21  ;;  %1946 = vmatmul.mubr.msk.f32.vlgmr.msra.gmra.mxu1 %vm26_vm1, %v1151_v21 }
0x1da5   :  { %1960 = vmatpush3.msra.mxu1 %v2324_v23  ;;  %1967 = vmatprep.mubr.msk.f32.mxu1 %vm2125_vm0, %v2124_v0 }
0x1da6   :  { %1961 = vmatprep.subr.mxu1 %v2124_v0 }
0x1da7   :  { %1962 = vmatpush3.msra.mxu1 %v2329_v24 }
0x1da8   :  { %1963 = vmatprep.subr.mxu1 %v2124_v0 }
0x1da9   :  { %1964 = vmatpush3.msra.mxu1 %v2337_v25 }
0x1daa   :  { %1965 = vmatprep.subr.mxu1 %v2124_v0 }
0x1dab   :  { %1966 = vmatpush3.msra.mxu1 %v2346_v26 }
0x1dac   :  { %1981 = vmatprep.subr.mxu1 %v2124_v0 }
0x1e64   :  { %v1225_v27 = vpop.f32.mrf.mxu1 }
0x1e65   :  { %v1229_v28 = vadd.f32 %v1716_v22, %v1225_v27 }
0x1e66   :  { %v1947_v29 = vpop.f32.mrf.mxu1 }
0x1e67   :  { %2084 = vtanh.f32 %v1229_v28  ;;  %v1718_v31 = vmul.f32 -1.442695, %v1229_v28 }
0x1e69   :  { %2086 = vpow2.f32 %v1718_v31 }
0x1e74   :  { %v2085_v30 = vpop.eup %2084 }
0x1e75   :  { %1239 = vrot.lane.b32.xlu0 %v2085_v30, %s2126_s24 }
0x1e76   :  { %v2087_v32 = vpop.eup %2086 }
0x1e77   :  { %v1233_v33 = vadd.f32 1.0, %v2087_v32 }
0x1e79   :  { %2088 = vrcp.f32 %v1233_v33 }
0x1e86   :  { %v2089_v34 = vpop.eup %2088 }
0x1e87   :  { %v1237_v36 = vmul.f32 %v2089_v34, %v1142_v17 }
0x1ee7   :  { %v1240_v35 = vpop.permute.xlu0 %1239 }
0x1ee8   :  { %v1242_v1 = vmul.f32 %v2089_v34, %v1240_v35 }
0x1eea   :  { %1244 = vrot.lane.b32.xlu1 %v1242_v1, %s2126_s24 }
0x1f5c   :  { %v1245_v37 = vpop.permute.xlu1 %1244 }
0x1f5d   :  { %v1247_v38 = vadd.f32 %v1245_v37, %v1237_v36 }
0x1f5f   :  { %2090 = vtanh.f32 %v1247_v38 }
0x1f6c   :  { %v2091_v39 = vpop.eup %2090 }
0x1f6d   :  { %1250 = vrot.lane.b32.xlu0 %v2091_v39, %s2126_s24 }
0x1fdf   :  { %v1251_v2 = vpop.permute.xlu0 %1250 }
0x1fe0   :  { %v1253_v3 = vmul.f32 %v2089_v34, %v1251_v2  ;;  %v1732_v34 = vld [vmem:[%s2516_s1 + $0x38] sm:$0xff] }
0x1fe2   :  { %1255 = vrot.lane.b32.xlu1 %v1253_v3, %s2127_s25 }
0x2054   :  { %v1256_v40 = vpop.permute.xlu1 %1255 }
0x2055   :  { %1719 = vst.msk [vmem:[%s2517_s4 + $0x18] sm:$0xff] %vm26_vm1, %v1256_v40  ;;  %1957 = vmatmul.mubr.msk.f32.vlgmr.msra.gmra.mxu0 %vm26_vm1, %v1256_v40 }
0x2056   :  { %1971 = vmatpush3.msra.mxu0 %v2324_v23  ;;  %1978 = vmatprep.mubr.msk.f32.mxu0 %vm2125_vm0, %v2124_v0 }
0x2057   :  { %1972 = vmatprep.subr.mxu0 %v2124_v0 }
0x2058   :  { %1973 = vmatpush3.msra.mxu0 %v2329_v24 }
0x2059   :  { %1974 = vmatprep.subr.mxu0 %v2124_v0 }
0x205a   :  { %1975 = vmatpush3.msra.mxu0 %v2337_v25 }
0x205b   :  { %1976 = vmatprep.subr.mxu0 %v2124_v0 }
0x205c   :  { %1977 = vmatpush3.msra.mxu0 %v2346_v26 }
0x2115   :  { %v1330_v4 = vpop.f32.mrf.mxu0 }
0x2116   :  { %v1334_v42 = vadd.f32 %v1720_v41, %v1330_v4 }
0x2117   :  { %v1958_v43 = vpop.f32.mrf.mxu0 }
0x2118   :  { %2092 = vtanh.f32 %v1334_v42  ;;  %v1722_v45 = vmul.f32 -1.442695, %v1334_v42 }
0x211a   :  { %2094 = vpow2.f32 %v1722_v45 }
0x2125   :  { %v2093_v44 = vpop.eup %2092 }
0x2126   :  { %1344 = vrot.lane.b32.xlu0 %v2093_v44, %s2126_s24 }
0x2127   :  { %v2095_v46 = vpop.eup %2094 }
0x2128   :  { %v1338_v47 = vadd.f32 1.0, %v2095_v46 }
0x212a   :  { %2096 = vrcp.f32 %v1338_v47 }
0x2137   :  { %v2097_v48 = vpop.eup %2096 }
0x2138   :  { %v1342_v51 = vmul.f32 %v2097_v48, %v1247_v38 }
0x2198   :  { %v1345_v49 = vpop.permute.xlu0 %1344 }
0x2199   :  { %v1347_v50 = vmul.f32 %v2097_v48, %v1345_v49 }
0x219b   :  { %1349 = vrot.lane.b32.xlu1 %v1347_v50, %s2126_s24 }
0x220d   :  { %v1350_v52 = vpop.permute.xlu1 %1349 }
0x220e   :  { %v1352_v53 = vadd.f32 %v1350_v52, %v1342_v51 }
0x2210   :  { %2098 = vtanh.f32 %v1352_v53 }
0x221d   :  { %v2099_v54 = vpop.eup %2098 }
0x221e   :  { %1355 = vrot.lane.b32.xlu0 %v2099_v54, %s2126_s24 }
0x2290   :  { %v1356_v55 = vpop.permute.xlu0 %1355 }
0x2291   :  { %v1358_v56 = vmul.f32 %v2097_v48, %v1356_v55 }
0x2293   :  { %1360 = vrot.lane.b32.xlu1 %v1358_v56, %s2127_s25 }
0x2305   :  { %v1361_v57 = vpop.permute.xlu1 %1360 }
0x2306   :  { %1723 = vst.msk [vmem:[%s2517_s4 + $0x20] sm:$0xff] %vm26_vm1, %v1361_v57  ;;  %1968 = vmatmul.mubr.msk.f32.vlgmr.msra.gmra.mxu1 %vm26_vm1, %v1361_v57 }
0x2307   :  { %1982 = vmatpush3.msra.mxu1 %v2324_v23  ;;  %1989 = vmatprep.mubr.msk.f32.mxu1 %vm2125_vm0, %v2124_v0 }
0x2308   :  { %1983 = vmatprep.subr.mxu1 %v2124_v0 }
0x2309   :  { %1984 = vmatpush3.msra.mxu1 %v2329_v24 }
0x230a   :  { %1985 = vmatprep.subr.mxu1 %v2124_v0 }
0x230b   :  { %1986 = vmatpush3.msra.mxu1 %v2337_v25 }
0x230c   :  { %1987 = vmatprep.subr.mxu1 %v2124_v0 }
0x230d   :  { %1988 = vmatpush3.msra.mxu1 %v2346_v26 }
0x23c6   :  { %v1435_v23 = vpop.f32.mrf.mxu1 }
0x23c7   :  { %v1439_v59 = vadd.f32 %v1724_v58, %v1435_v23 }
0x23c8   :  { %v1969_v60 = vpop.f32.mrf.mxu1 }
0x23c9   :  { %2100 = vtanh.f32 %v1439_v59  ;;  %v1726_v24 = vmul.f32 -1.442695, %v1439_v59 }
0x23cb   :  { %2102 = vpow2.f32 %v1726_v24 }
0x23d6   :  { %v2101_v61 = vpop.eup %2100 }
0x23d7   :  { %1449 = vrot.lane.b32.xlu0 %v2101_v61, %s2126_s24 }
0x23d8   :  { %v2103_v62 = vpop.eup %2102 }
0x23d9   :  { %v1443_v63 = vadd.f32 1.0, %v2103_v62 }
0x23db   :  { %2104 = vrcp.f32 %v1443_v63 }
0x23e8   :  { %v2105_v25 = vpop.eup %2104 }
0x23e9   :  { %v1447_v26 = vmul.f32 %v2105_v25, %v1352_v53 }
0x2449   :  { %v1450_v0 = vpop.permute.xlu0 %1449 }
0x244a   :  { %v1452_v5 = vmul.f32 %v2105_v25, %v1450_v0 }
0x244c   :  { %1454 = vrot.lane.b32.xlu1 %v1452_v5, %s2126_s24 }
0x24be   :  { %v1455_v6 = vpop.permute.xlu1 %1454 }
0x24bf   :  { %v1457_v7 = vadd.f32 %v1455_v6, %v1447_v26 }
0x24c1   :  { %2106 = vtanh.f32 %v1457_v7 }
0x24ce   :  { %v2107_v8 = vpop.eup %2106 }
0x24cf   :  { %1460 = vrot.lane.b32.xlu0 %v2107_v8, %s2126_s24 }
0x2541   :  { %v1461_v9 = vpop.permute.xlu0 %1460 }
0x2542   :  { %v1463_v10 = vmul.f32 %v2105_v25, %v1461_v9 }
0x2544   :  { %1465 = vrot.lane.b32.xlu1 %v1463_v10, %s2127_s25 }
0x25b6   :  { %v1466_v11 = vpop.permute.xlu1 %1465 }
0x25b7   :  { %1727 = vst.msk [vmem:[%s2517_s4 + $0x28] sm:$0xff] %vm26_vm1, %v1466_v11  ;;  %1979 = vmatmul.mubr.msk.f32.vlgmr.msra.gmra.mxu0 %vm26_vm1, %v1466_v11 }
0x2677   :  { %v1540_v13 = vpop.f32.mrf.mxu0 }
0x2678   :  { %v1544_v14 = vadd.f32 %v1728_v12, %v1540_v13 }
0x2679   :  { %v1980_v15 = vpop.f32.mrf.mxu0 }
0x267a   :  { %2108 = vtanh.f32 %v1544_v14  ;;  %v1730_v17 = vmul.f32 -1.442695, %v1544_v14 }
0x267c   :  { %2110 = vpow2.f32 %v1730_v17 }
0x2687   :  { %v2109_v16 = vpop.eup %2108 }
0x2688   :  { %1554 = vrot.lane.b32.xlu0 %v2109_v16, %s2126_s24 }
0x2689   :  { %v2111_v18 = vpop.eup %2110 }
0x268a   :  { %v1548_v19 = vadd.f32 1.0, %v2111_v18 }
0x268c   :  { %2112 = vrcp.f32 %v1548_v19 }
0x2699   :  { %v2113_v20 = vpop.eup %2112 }
0x269a   :  { %v1552_v27 = vmul.f32 %v2113_v20, %v1457_v7 }
0x26fa   :  { %v1555_v21 = vpop.permute.xlu0 %1554 }
0x26fb   :  { %v1557_v22 = vmul.f32 %v2113_v20, %v1555_v21 }
0x26fd   :  { %1559 = vrot.lane.b32.xlu1 %v1557_v22, %s2126_s24 }
0x276f   :  { %v1560_v28 = vpop.permute.xlu1 %1559 }
0x2770   :  { %v1562_v29 = vadd.f32 %v1560_v28, %v1552_v27 }
0x2772   :  { %2114 = vtanh.f32 %v1562_v29 }
0x277f   :  { %v2115_v30 = vpop.eup %2114 }
0x2780   :  { %1565 = vrot.lane.b32.xlu0 %v2115_v30, %s2126_s24 }
0x27f2   :  { %v1566_v31 = vpop.permute.xlu0 %1565 }
0x27f3   :  { %v1568_v32 = vmul.f32 %v2113_v20, %v1566_v31 }
0x27f5   :  { %1570 = vrot.lane.b32.xlu1 %v1568_v32, %s2127_s25 }
0x2867   :  { %v1571_v33 = vpop.permute.xlu1 %1570 }
0x2868   :  { %1731 = vst.msk [vmem:[%s2517_s4 + $0x30] sm:$0xff] %vm26_vm1, %v1571_v33  ;;  %1990 = vmatmul.mubr.msk.f32.vlgmr.msra.gmra.mxu1 %vm26_vm1, %v1571_v33 }
0x2928   :  { %v1645_v35 = vpop.f32.mrf.mxu1 }
0x2929   :  { %v1649_v1 = vadd.f32 %v1732_v34, %v1645_v35 }
0x292a   :  { %v1991_v36 = vpop.f32.mrf.mxu1 }
0x292b   :  { %2116 = vtanh.f32 %v1649_v1  ;;  %v1734_v38 = vmul.f32 -1.442695, %v1649_v1 }
0x292d   :  { %2118 = vpow2.f32 %v1734_v38 }
0x2938   :  { %v2117_v37 = vpop.eup %2116 }
0x2939   :  { %1659 = vrot.lane.b32.xlu0 %v2117_v37, %s2126_s24 }
0x293a   :  { %v2119_v39 = vpop.eup %2118 }
0x293b   :  { %v1653_v2 = vadd.f32 1.0, %v2119_v39 }
0x293d   :  { %2120 = vrcp.f32 %v1653_v2 }
0x294a   :  { %v2121_v3 = vpop.eup %2120 }
0x294b   :  { %v1657_v4 = vmul.f32 %v2121_v3, %v1562_v29 }
0x29ab   :  { %v1660_v40 = vpop.permute.xlu0 %1659 }
0x29ac   :  { %v1662_v41 = vmul.f32 %v2121_v3, %v1660_v40 }
0x29ae   :  { %1664 = vrot.lane.b32.xlu1 %v1662_v41, %s2126_s24 }
0x2a20   :  { %v1665_v42 = vpop.permute.xlu1 %1664 }
0x2a21   :  { %v1667_v43 = vadd.f32 %v1665_v42, %v1657_v4 }
0x2a23   :  { %2122 = vtanh.f32 %v1667_v43 }
0x2a30   :  { %v2123_v44 = vpop.eup %2122 }
0x2a31   :  { %1670 = vrot.lane.b32.xlu0 %v2123_v44, %s2126_s24 }
0x2aa3   :  { %v1671_v45 = vpop.permute.xlu0 %1670 }
0x2aa4   :  { %v1673_v46 = vmul.f32 %v2121_v3, %v1671_v45 }
0x2aa6   :  { %1675 = vrot.lane.b32.xlu1 %v1673_v46, %s2127_s25 }
0x2b18   :  { %v1676_v47 = vpop.permute.xlu1 %1675 }
0x2b19   :  { %1735 = vst.msk [vmem:[%s2517_s4 + $0x38] sm:$0xff] %vm26_vm1, %v1676_v47 }

</bundles_post_ra>
